<compile_context>
chip_gen: v5e
topology: v5e:2x2
jax: 0.10.0
libtpu: 0.0.40
codegen_flags: <defaults>
</compile_context>

<pallas_src>
import jax
import jax.numpy as jnp
from jax.experimental import pallas as pl
from jax.experimental.pallas import tpu as pltpu


def _round_up(x, m):
    return (x + m - 1) // m * m


def _make_rotate_loss_kernel(confidence, batch, tile_b, n_per_core):
    confidence = float(confidence)

    def kernel(neg_ref, wneg_ref, pos_ref, wd_ref, o_ref, acc_n, acc_p, acc_w):
        c = pl.program_id(0)          # core-split axis ("parallel")
        j = pl.program_id(1)          # per-core column-tile axis ("arbitrary")

        @pl.when(j == 0)
        def _init():
            acc_n[...] = jnp.zeros_like(acc_n)
            acc_p[...] = jnp.zeros_like(acc_p)
            acc_w[...] = jnp.zeros_like(acc_w)

        # ---- positive / weight path: sublane-dense (8, tile_b // 8). -------
        # Padded entries carry wd == 0, so no masking is needed here.
        p = pos_ref[...].astype(jnp.float32)
        wd = wd_ref[...].astype(jnp.float32)
        ls_p = jnp.minimum(p, 0.0) - jnp.log(1.0 + jnp.exp(-jnp.abs(p)))
        acc_p[...] += wd * ls_p
        acc_w[...] += wd

        # ---- negative path: (R, tile_b), batch on the 128-lane axis. -------
        n = neg_ref[...].astype(jnp.float32)
        wn = wneg_ref[...].astype(jnp.float32)

        # Logical (unclamped) column-tile index: masks both the ragged last
        # tile and any clamped duplicate tile from the core split.
        t = c * n_per_core + j
        col = t * tile_b + jax.lax.broadcasted_iota(jnp.int32, (1, tile_b), 1)
        valid = col < batch

        # Self-adversarial softmax fused with logsigmoid(-n):
        #   n_sc = sum_r(e * logsigmoid(-n)) / sum_r(e),  e = exp(n - max_r n)
        m = jnp.max(n, axis=0, keepdims=True)
        e = jnp.exp(n - m)
        ls_n = -(jnp.maximum(n, 0.0) + jnp.log(1.0 + jnp.exp(-jnp.abs(n))))
        numer = jnp.sum(e * ls_n, axis=0, keepdims=True)
        denom = jnp.sum(e, axis=0, keepdims=True)       # >= 1 on valid columns
        n_sc = numer * pl.reciprocal(denom, approx=False)

        # Select-based masking: garbage/NaN in padded lanes never reaches sums.
        acc_n[...] += jnp.where(valid, wn * n_sc, 0.0)

        @pl.when(j == pl.num_programs(1) - 1)
        def _finalize():
            p_num = jnp.sum(acc_p[...]) * confidence
            n_num = jnp.sum(acc_n[...]) * confidence
            w_sum = jnp.sum(acc_w[...])
            lane = jax.lax.broadcasted_iota(jnp.int32, (1, 1, 128), 2)
            vals = jnp.where(lane == 0, p_num,
                   jnp.where(lane == 1, n_num,
                   jnp.where(lane == 2, w_sum, 0.0)))
            o_ref[...] = vals.astype(o_ref.dtype)

    return kernel


def rotate_loss(score, label, subsampling_weight, confidence=1.0,
                neg_ratio=10, block_b=None, num_cores=2, check_labels=False):
    """Pallas implementation of RotatELoss.forward (neg_ratio > 0 path)."""
    if neg_ratio <= 0:
        # TODO(synk): neg_ratio <= 0 path (loss = p_loss over the raw scores,
        # no pos/neg split) is not exercised by the default args.
        raise NotImplementedError("neg_ratio <= 0 path not implemented")

    B, C = score.shape
    if C != 1 + neg_ratio:
        raise ValueError((C, neg_ratio))
    R = neg_ratio

    if check_labels:
        # Debug-only structural check (eager mode only).
        ok = jnp.all(label[:, 0] > 0) & jnp.all(label[:, 1:] < 0)
        if not bool(ok):
            raise ValueError("label layout must be [+ | - ... -] per row")
    else:
        del label  # layout is structural: col 0 positive, cols 1: negatives.

    # ---- tiling -----------------------------------------------------------
    if block_b is None:
        # 32768 keeps the double-buffered footprint (~8 MiB at R=16) under the
        # v5e 16-MiB scoped-VMEM default; on v6e/v7x it can be raised to 65536
        # together with vmem_limit_bytes in CompilerParams.
        tile_b = min(32768, _round_up(B, 1024))
    else:
        tile_b = int(block_b)
        if tile_b % 1024 != 0:
            raise ValueError("block_b must be a multiple of 1024")
    td = tile_b // 8

    n_tiles = pl.cdiv(B, tile_b)
    num_cores = max(1, min(int(num_cores), n_tiles))
    n_per_core = pl.cdiv(n_tiles, num_cores)
    padded_b = num_cores * n_per_core * tile_b

    # ---- layout (one fused slice+transpose / pad+reshape pass) -------------
    # TODO(synk): ideally the score producer emits these layouts directly (or
    # allow_input_fusion folds them into the pallas_call); here it is a single
    # small XLA layout op instead of sublane-misaligned slicing in the kernel.
    neg_t = jnp.transpose(score[:, 1:])                     # (R, B) lane-dense
    w = subsampling_weight.reshape(B)
    w_neg = w.reshape(1, B)                                 # aligns with neg_t

    pad = padded_b - B
    pos_d = jnp.pad(score[:, 0], (0, pad)).reshape(8, padded_b // 8)
    w_d = jnp.pad(w, (0, pad)).reshape(8, padded_b // 8)    # pad w=0 -> no-op terms

    def ragged_map(c, j):
        return (0, jnp.minimum(c * n_per_core + j, n_tiles - 1))

    def dense_map(c, j):
        return (0, c * n_per_core + j)

    cost = pl.CostEstimate(
        flops=10 * (R + 1) * B,
        transcendentals=(3 * R + 3) * B,
        bytes_accessed=(R + 3) * B * 4 + num_cores * 512,
    )

    out = pl.pallas_call(
        _make_rotate_loss_kernel(confidence, B, tile_b, n_per_core),
        out_shape=jax.ShapeDtypeStruct((num_cores, 1, 128), jnp.float32),
        grid_spec=pltpu.PrefetchScalarGridSpec(
            num_scalar_prefetch=0,
            grid=(num_cores, n_per_core),
            in_specs=[
                pl.BlockSpec((R, tile_b), ragged_map),   # negatives (R, B)
                pl.BlockSpec((1, tile_b), ragged_map),   # weights, column layout
                pl.BlockSpec((8, td), dense_map),        # positives, dense layout
                pl.BlockSpec((8, td), dense_map),        # weights, dense layout
            ],
            out_specs=pl.BlockSpec((1, 1, 128), lambda c, j: (c, 0, 0)),
            scratch_shapes=[
                pltpu.VMEM((1, tile_b), jnp.float32),    # sum w * n_sc (per lane)
                pltpu.VMEM((8, td), jnp.float32),        # sum w * logsigmoid(p)
                pltpu.VMEM((8, td), jnp.float32),        # sum w
            ],
        ),
        compiler_params=pltpu.CompilerParams(
            dimension_semantics=("parallel", "arbitrary"),
        ),
        cost_estimate=cost,
    )(neg_t, w_neg, pos_d, w_d)

    # Combine per-core partial sums:  loss = -(p + n) / (2 * w_sum).
    p_num = out[:, 0, 0].sum()
    n_num = out[:, 0, 1].sum()
    w_sum = out[:, 0, 2].sum()
    return -(p_num + n_num) / (2.0 * w_sum)


if __name__ == "__main__":
    key = jax.random.PRNGKey(0)
    # B not a multiple of the tile: exercises the ragged tile, the 2-core grid
    # split (with one clamped duplicate tile fully masked), dense padding, and
    # the accumulator init/finalize pattern.
    B, neg_ratio = 2500, 16

    k1, k2 = jax.random.split(key)
    score = jax.random.normal(k1, (B, 1 + neg_ratio), dtype=jnp.float32)
    label = jnp.concatenate(
        [jnp.ones((B, 1), jnp.float32), -jnp.ones((B, neg_ratio), jnp.float32)],
        axis=1,
    )
    subsampling_weight = jax.random.uniform(
        k2, (B,), minval=0.5, maxval=1.5, dtype=jnp.float32
    )

    loss = rotate_loss(score, label, subsampling_weight,
                       confidence=1.0, neg_ratio=neg_ratio,
                       block_b=1024, num_cores=2, check_labels=True)
    loss = jax.block_until_ready(loss)

    # Pure-JAX reference (mirrors the PyTorch forward exactly).
    w = subsampling_weight
    p_s = jax.nn.log_sigmoid(score[:, 0]) * 1.0
    p_loss = -(w * p_s).sum() / w.sum()
    n_raw = score[:, 1:]
    n_s = (jax.nn.softmax(n_raw, axis=-1)
           * jax.nn.log_sigmoid(-n_raw)).sum(axis=-1) * 1.0
    n_loss = -(w * n_s).sum() / w.sum()
    ref = (p_loss + n_loss) / 2.0

    assert jnp.allclose(loss, ref, atol=1e-5, rtol=1e-4), (loss, ref)
    print("KERNEL_OK")
</pallas_src>

<mosaic_0001>
module attributes {stable_mosaic.version = 11 : i64} {
  func.func @kernel(%arg0: i32, %arg1: i32, %arg2: memref<16x1024xf32, #tpu.memory_space<vmem>>, %arg3: memref<1x1024xf32, #tpu.memory_space<vmem>>, %arg4: memref<8x128xf32, #tpu.memory_space<vmem>>, %arg5: memref<8x128xf32, #tpu.memory_space<vmem>>, %arg6: memref<1x1x128xf32, #tpu.memory_space<vmem>>, %arg7: memref<1x1024xf32, #tpu.memory_space<vmem>>, %arg8: memref<8x128xf32, #tpu.memory_space<vmem>>, %arg9: memref<8x128xf32, #tpu.memory_space<vmem>>) attributes {dimension_semantics = [#tpu.dimension_semantics<parallel>, #tpu.dimension_semantics<arbitrary>], iteration_bounds = array<i64: 2, 2>, scalar_prefetch = 0 : i64, scratch_operands = 3 : i64, tpu.core_type = #tpu.core_type<tc>, window_params = [{transform_indices = @transform_0, window_bounds = array<i64: 16, 1024>}, {transform_indices = @transform_1, window_bounds = array<i64: 1, 1024>}, {transform_indices = @transform_2, window_bounds = array<i64: 8, 128>}, {transform_indices = @transform_3, window_bounds = array<i64: 8, 128>}, {transform_indices = @transform_4, window_bounds = array<i64: 1, 1, 128>}]} {
    %c0_i32 = arith.constant 0 : i32
    %0 = arith.cmpi eq, %arg1, %c0_i32 : i32
    %1 = arith.extui %0 : i1 to i32
    %c0_i32_0 = arith.constant 0 : i32
    %2 = arith.cmpi ne, %1, %c0_i32_0 : i32
    scf.if %2 {
      %cst_31 = arith.constant 0.000000e+00 : f32
      %65 = vector.broadcast %cst_31 : f32 to vector<1x1024xf32>
      %c0_32 = arith.constant 0 : index
      %c0_33 = arith.constant 0 : index
      %66 = vector.load %arg7[%c0_32, %c0_33] : memref<1x1024xf32, #tpu.memory_space<vmem>>, vector<1x1024xf32>
      tpu.vector_store %arg7[%c0_32, %c0_33], %65 {strides = array<i32>} : memref<1x1024xf32, #tpu.memory_space<vmem>>, vector<1x1024xf32>,
      %cst_34 = arith.constant 0.000000e+00 : f32
      %67 = vector.broadcast %cst_34 : f32 to vector<8x128xf32>
      %c0_35 = arith.constant 0 : index
      %c0_36 = arith.constant 0 : index
      %68 = vector.load %arg8[%c0_35, %c0_36] : memref<8x128xf32, #tpu.memory_space<vmem>>, vector<8x128xf32>
      tpu.vector_store %arg8[%c0_35, %c0_36], %67 {strides = array<i32>} : memref<8x128xf32, #tpu.memory_space<vmem>>, vector<8x128xf32>,
      %cst_37 = arith.constant 0.000000e+00 : f32
      %69 = vector.broadcast %cst_37 : f32 to vector<8x128xf32>
      %c0_38 = arith.constant 0 : index
      %c0_39 = arith.constant 0 : index
      %70 = vector.load %arg9[%c0_38, %c0_39] : memref<8x128xf32, #tpu.memory_space<vmem>>, vector<8x128xf32>
      tpu.vector_store %arg9[%c0_38, %c0_39], %69 {strides = array<i32>} : memref<8x128xf32, #tpu.memory_space<vmem>>, vector<8x128xf32>,
    } else {
    }
    %c0 = arith.constant 0 : index
    %c0_1 = arith.constant 0 : index
    %3 = vector.load %arg4[%c0, %c0_1] : memref<8x128xf32, #tpu.memory_space<vmem>>, vector<8x128xf32>
    %c0_2 = arith.constant 0 : index
    %c0_3 = arith.constant 0 : index
    %4 = vector.load %arg5[%c0_2, %c0_3] : memref<8x128xf32, #tpu.memory_space<vmem>>, vector<8x128xf32>
    %cst = arith.constant 0.000000e+00 : f32
    %5 = vector.broadcast %cst : f32 to vector<8x128xf32>
    %6 = arith.minimumf %3, %5 : vector<8x128xf32>
    %7 = math.absf %3 : vector<8x128xf32>
    %cst_4 = arith.constant 0.000000e+00 : f32
    %8 = vector.broadcast %cst_4 : f32 to vector<8x128xf32>
    %9 = arith.subf %8, %7 : vector<8x128xf32>
    %10 = math.exp %9 : vector<8x128xf32>
    %cst_5 = arith.constant 1.000000e+00 : f32
    %11 = vector.broadcast %cst_5 : f32 to vector<8x128xf32>
    %12 = arith.addf %11, %10 : vector<8x128xf32>
    %13 = math.log %12 : vector<8x128xf32>
    %14 = arith.subf %6, %13 : vector<8x128xf32>
    %c0_6 = arith.constant 0 : index
    %c0_7 = arith.constant 0 : index
    %15 = vector.load %arg8[%c0_6, %c0_7] : memref<8x128xf32, #tpu.memory_space<vmem>>, vector<8x128xf32>
    %16 = arith.mulf %4, %14 : vector<8x128xf32>
    %17 = arith.addf %15, %16 : vector<8x128xf32>
    %c0_8 = arith.constant 0 : index
    %c0_9 = arith.constant 0 : index
    %18 = vector.load %arg8[%c0_8, %c0_9] : memref<8x128xf32, #tpu.memory_space<vmem>>, vector<8x128xf32>
    tpu.vector_store %arg8[%c0_8, %c0_9], %17 {strides = array<i32>} : memref<8x128xf32, #tpu.memory_space<vmem>>, vector<8x128xf32>,
    %c0_10 = arith.constant 0 : index
    %c0_11 = arith.constant 0 : index
    %19 = vector.load %arg9[%c0_10, %c0_11] : memref<8x128xf32, #tpu.memory_space<vmem>>, vector<8x128xf32>
    %20 = arith.addf %19, %4 : vector<8x128xf32>
    %c0_12 = arith.constant 0 : index
    %c0_13 = arith.constant 0 : index
    %21 = vector.load %arg9[%c0_12, %c0_13] : memref<8x128xf32, #tpu.memory_space<vmem>>, vector<8x128xf32>
    tpu.vector_store %arg9[%c0_12, %c0_13], %20 {strides = array<i32>} : memref<8x128xf32, #tpu.memory_space<vmem>>, vector<8x128xf32>,
    %c0_14 = arith.constant 0 : index
    %c0_15 = arith.constant 0 : index
    %22 = vector.load %arg2[%c0_14, %c0_15] : memref<16x1024xf32, #tpu.memory_space<vmem>>, vector<16x1024xf32>
    %c0_16 = arith.constant 0 : index
    %c0_17 = arith.constant 0 : index
    %23 = vector.load %arg3[%c0_16, %c0_17] : memref<1x1024xf32, #tpu.memory_space<vmem>>, vector<1x1024xf32>
    %c2_i32 = arith.constant 2 : i32
    %24 = arith.muli %arg0, %c2_i32 : i32
    %25 = arith.addi %24, %arg1 : i32
    %c1024_i32 = arith.constant 1024 : i32
    %26 = arith.muli %25, %c1024_i32 : i32
    %27 = tpu.iota {dimensions = array<i32: 1>} : vector<1x1024xi32>
    %28 = vector.broadcast %26 : i32 to vector<1x1024xi32>
    %29 = arith.addi %28, %27 : vector<1x1024xi32>
    %c2500_i32 = arith.constant 2500 : i32
    %30 = vector.broadcast %c2500_i32 : i32 to vector<1x1024xi32>
    %31 = arith.cmpi slt, %29, %30 : vector<1x1024xi32>
    %cst_18 = arith.constant dense<0xFF800000> : vector<1024xf32>
    %32 = vector.multi_reduction <maximumf>, %22, %cst_18 [0] : vector<16x1024xf32> to vector<1024xf32>
    %33 = vector.shape_cast %32 : vector<1024xf32> to vector<1x1024xf32>
    %34 = vector.broadcast %33 : vector<1x1024xf32> to vector<16x1024xf32>
    %35 = arith.subf %22, %34 : vector<16x1024xf32>
    %36 = math.exp %35 : vector<16x1024xf32>
    %cst_19 = arith.constant 0.000000e+00 : f32
    %37 = vector.broadcast %cst_19 : f32 to vector<16x1024xf32>
    %38 = arith.maximumf %22, %37 : vector<16x1024xf32>
    %39 = math.absf %22 : vector<16x1024xf32>
    %cst_20 = arith.constant 0.000000e+00 : f32
    %40 = vector.broadcast %cst_20 : f32 to vector<16x1024xf32>
    %41 = arith.subf %40, %39 : vector<16x1024xf32>
    %42 = math.exp %41 : vector<16x1024xf32>
    %cst_21 = arith.constant 1.000000e+00 : f32
    %43 = vector.broadcast %cst_21 : f32 to vector<16x1024xf32>
    %44 = arith.addf %43, %42 : vector<16x1024xf32>
    %45 = math.log %44 : vector<16x1024xf32>
    %46 = arith.addf %38, %45 : vector<16x1024xf32>
    %cst_22 = arith.constant 0.000000e+00 : f32
    %47 = vector.broadcast %cst_22 : f32 to vector<16x1024xf32>
    %48 = arith.subf %47, %46 : vector<16x1024xf32>
    %49 = arith.mulf %36, %48 : vector<16x1024xf32>
    %cst_23 = arith.constant dense<0.000000e+00> : vector<1024xf32>
    %50 = vector.multi_reduction <add>, %49, %cst_23 [0] : vector<16x1024xf32> to vector<1024xf32>
    %51 = vector.shape_cast %50 : vector<1024xf32> to vector<1x1024xf32>
    %cst_24 = arith.constant dense<0.000000e+00> : vector<1024xf32>
    %52 = vector.multi_reduction <add>, %36, %cst_24 [0] : vector<16x1024xf32> to vector<1024xf32>
    %53 = vector.shape_cast %52 : vector<1024xf32> to vector<1x1024xf32>
    %54 = tpu.reciprocal %53 : vector<1x1024xf32> -> vector<1x1024xf32>
    %55 = arith.mulf %51, %54 : vector<1x1024xf32>
    %c0_25 = arith.constant 0 : index
    %c0_26 = arith.constant 0 : index
    %56 = vector.load %arg7[%c0_25, %c0_26] : memref<1x1024xf32, #tpu.memory_space<vmem>>, vector<1x1024xf32>
    %57 = arith.mulf %23, %55 : vector<1x1024xf32>
    %cst_27 = arith.constant 0.000000e+00 : f32
    %58 = vector.broadcast %cst_27 : f32 to vector<1x1024xf32>
    %59 = arith.select %31, %57, %58 : vector<1x1024xi1>, vector<1x1024xf32>
    %60 = arith.addf %56, %59 : vector<1x1024xf32>
    %c0_28 = arith.constant 0 : index
    %c0_29 = arith.constant 0 : index
    %61 = vector.load %arg7[%c0_28, %c0_29] : memref<1x1024xf32, #tpu.memory_space<vmem>>, vector<1x1024xf32>
    tpu.vector_store %arg7[%c0_28, %c0_29], %60 {strides = array<i32>} : memref<1x1024xf32, #tpu.memory_space<vmem>>, vector<1x1024xf32>,
    %c1_i32 = arith.constant 1 : i32
    %62 = arith.cmpi eq, %arg1, %c1_i32 : i32
    %63 = arith.extui %62 : i1 to i32
    %c0_i32_30 = arith.constant 0 : i32
    %64 = arith.cmpi ne, %63, %c0_i32_30 : i32
    scf.if %64 {
      %c0_31 = arith.constant 0 : index
      %c0_32 = arith.constant 0 : index
      %65 = vector.load %arg8[%c0_31, %c0_32] : memref<8x128xf32, #tpu.memory_space<vmem>>, vector<8x128xf32>
      %66 = vector.shape_cast %65 : vector<8x128xf32> to vector<1x8x128xf32>
      %cst_33 = arith.constant dense<0.000000e+00> : vector<1xf32>
      %67 = vector.multi_reduction <add>, %66, %cst_33 [1, 2] : vector<1x8x128xf32> to vector<1xf32>
      %68 = vector.shape_cast %67 : vector<1xf32> to vector<1x1x1xf32>
      %69 = vector.extract %68[0, 0, 0] : f32 from vector<1x1x1xf32>
      %cst_34 = arith.constant 1.000000e+00 : f32
      %70 = arith.mulf %69, %cst_34 : f32
      %c0_35 = arith.constant 0 : index
      %c0_36 = arith.constant 0 : index
      %71 = vector.load %arg7[%c0_35, %c0_36] : memref<1x1024xf32, #tpu.memory_space<vmem>>, vector<1x1024xf32>
      %72 = vector.shape_cast %71 : vector<1x1024xf32> to vector<1x1x1024xf32>
      %cst_37 = arith.constant dense<0.000000e+00> : vector<1xf32>
      %73 = vector.multi_reduction <add>, %72, %cst_37 [1, 2] : vector<1x1x1024xf32> to vector<1xf32>
      %74 = vector.shape_cast %73 : vector<1xf32> to vector<1x1x1xf32>
      %75 = vector.extract %74[0, 0, 0] : f32 from vector<1x1x1xf32>
      %cst_38 = arith.constant 1.000000e+00 : f32
      %76 = arith.mulf %75, %cst_38 : f32
      %c0_39 = arith.constant 0 : index
      %c0_40 = arith.constant 0 : index
      %77 = vector.load %arg9[%c0_39, %c0_40] : memref<8x128xf32, #tpu.memory_space<vmem>>, vector<8x128xf32>
      %78 = vector.shape_cast %77 : vector<8x128xf32> to vector<1x8x128xf32>
      %cst_41 = arith.constant dense<0.000000e+00> : vector<1xf32>
      %79 = vector.multi_reduction <add>, %78, %cst_41 [1, 2] : vector<1x8x128xf32> to vector<1xf32>
      %80 = vector.shape_cast %79 : vector<1xf32> to vector<1x1x1xf32>
      %81 = vector.extract %80[0, 0, 0] : f32 from vector<1x1x1xf32>
      %82 = tpu.iota {dimensions = array<i32: 2>} : vector<1x1x128xi32>
      %c0_i32_42 = arith.constant 0 : i32
      %83 = vector.broadcast %c0_i32_42 : i32 to vector<1x1x128xi32>
      %84 = arith.cmpi eq, %82, %83 : vector<1x1x128xi32>
      %c1_i32_43 = arith.constant 1 : i32
      %85 = vector.broadcast %c1_i32_43 : i32 to vector<1x1x128xi32>
      %86 = arith.cmpi eq, %82, %85 : vector<1x1x128xi32>
      %c2_i32_44 = arith.constant 2 : i32
      %87 = vector.broadcast %c2_i32_44 : i32 to vector<1x1x128xi32>
      %88 = arith.cmpi eq, %82, %87 : vector<1x1x128xi32>
      %cst_45 = arith.constant 0.000000e+00 : f32
      %89 = vector.broadcast %81 : f32 to vector<1x1x128xf32>
      %90 = vector.broadcast %cst_45 : f32 to vector<1x1x128xf32>
      %91 = arith.select %88, %89, %90 : vector<1x1x128xi1>, vector<1x1x128xf32>
      %92 = vector.broadcast %76 : f32 to vector<1x1x128xf32>
      %93 = arith.select %86, %92, %91 : vector<1x1x128xi1>, vector<1x1x128xf32>
      %94 = vector.broadcast %70 : f32 to vector<1x1x128xf32>
      %95 = arith.select %84, %94, %93 : vector<1x1x128xi1>, vector<1x1x128xf32>
      %c0_46 = arith.constant 0 : index
      %c0_47 = arith.constant 0 : index
      %c0_48 = arith.constant 0 : index
      %96 = vector.load %arg6[%c0_46, %c0_47, %c0_48] : memref<1x1x128xf32, #tpu.memory_space<vmem>>, vector<1x1x128xf32>
      tpu.vector_store %arg6[%c0_46, %c0_47, %c0_48], %95 {strides = array<i32>} : memref<1x1x128xf32, #tpu.memory_space<vmem>>, vector<1x1x128xf32>,
    } else {
    }
    return
  }
  func.func @transform_0(%arg0: i32, %arg1: i32) -> (i32, i32) {
    %c2_i32 = arith.constant 2 : i32
    %0 = arith.muli %arg0, %c2_i32 : i32
    %1 = arith.addi %0, %arg1 : i32
    %c2_i32_0 = arith.constant 2 : i32
    %2 = arith.minsi %1, %c2_i32_0 : i32
    %c0_i32 = arith.constant 0 : i32
    %c0_i32_1 = arith.constant 0 : i32
    return %c0_i32, %2 : i32, i32
  }
  func.func @transform_1(%arg0: i32, %arg1: i32) -> (i32, i32) {
    %c2_i32 = arith.constant 2 : i32
    %0 = arith.muli %arg0, %c2_i32 : i32
    %1 = arith.addi %0, %arg1 : i32
    %c2_i32_0 = arith.constant 2 : i32
    %2 = arith.minsi %1, %c2_i32_0 : i32
    %c0_i32 = arith.constant 0 : i32
    %c0_i32_1 = arith.constant 0 : i32
    return %c0_i32, %2 : i32, i32
  }
  func.func @transform_2(%arg0: i32, %arg1: i32) -> (i32, i32) {
    %c2_i32 = arith.constant 2 : i32
    %0 = arith.muli %arg0, %c2_i32 : i32
    %1 = arith.addi %0, %arg1 : i32
    %c0_i32 = arith.constant 0 : i32
    %c0_i32_0 = arith.constant 0 : i32
    return %c0_i32, %1 : i32, i32
  }
  func.func @transform_3(%arg0: i32, %arg1: i32) -> (i32, i32) {
    %c2_i32 = arith.constant 2 : i32
    %0 = arith.muli %arg0, %c2_i32 : i32
    %1 = arith.addi %0, %arg1 : i32
    %c0_i32 = arith.constant 0 : i32
    %c0_i32_0 = arith.constant 0 : i32
    return %c0_i32, %1 : i32, i32
  }
  func.func @transform_4(%arg0: i32, %arg1: i32) -> (i32, i32, i32) {
    %c0_i32 = arith.constant 0 : i32
    %c0_i32_0 = arith.constant 0 : i32
    %c0_i32_1 = arith.constant 0 : i32
    return %arg0, %c0_i32, %c0_i32_0 : i32, i32, i32
  }
}

</mosaic_0001>

<bundles_post_ra>
// kernel: tpu_custom_call.1
= control target key start
LH: loop header
LB: loop body
LE: loop exit
PB: predicated region body
PF: predicated region fallthrough
CT: control target
= control target key end

     0   :  { %s2819_s0 = inlined_call_operand.hbm [shape: f32[16,2500], index: 0, kind: input, shape index: {}]   ;;  %s2820_s1 = inlined_call_operand.hbm [shape: f32[1,2500], index: 1, kind: input, shape index: {}]   ;;  %s2821_s2 = inlined_call_operand.hbm [shape: f32[8,512], index: 2, kind: input, shape index: {}]   ;;  %s2822_s3 = inlined_call_operand.hbm [shape: f32[8,512], index: 3, kind: input, shape index: {}]   ;;  %s2823_s4 = inlined_call_operand.hbm [shape: f32[2,1,128], index: 4, kind: output, shape index: {}]  }
   0x1   :  { %2844 = sst [smem:[#allocation38_spill]] %s2823_s4 }
   0x2   :  { %9 = vsyncpa [#allocation6], 0 }
   0x3   :  { %11 = vsyncpa [#allocation6 + $0x1], 0 }
   0x4   :  { %12 = vsyncpa [#allocation9], 0 }
   0x5   :  { %14 = vsyncpa [#allocation9 + $0x1], 0 }
   0x6   :  { %15 = vsyncpa [#allocation12], 0 }
   0x7   :  { %17 = vsyncpa [#allocation12 + $0x1], 0 }
   0x8   :  { %18 = vsyncpa [#allocation7], 0 }
   0x9   :  { %20 = vsyncpa [#allocation7 + $0x1], 0  ;;  %s1933_s15 = smov 0   ;;  %s1935_s16 = smov 0  }
   0xa   :  { %s1937_s17 = smov 0   ;;  %s1939_s18 = smov 0  }
   0xb   :  { %s1941_s19 = smov 0   ;;  %s1943_s20 = smov 0  }
   0xc   :  { %s1945_s21 = smov 0   ;;  %s1947_s22 = smov 0  }
   0xd   :  { %s1949_s23 = smov 0   ;;  %s1951_s24 = smov 0  }
   0xe   :  { %s1953_s25 = smov 0   ;;  %s1955_s26 = smov 0  }
   0xf   :  { %s1957_s27 = smov 0   ;;  %s1959_s28 = smov 0  }
  0x10 LB: > { %2845 = sst [smem:[#allocation19_spill]] %s1849_s15  ;;  %s2004_s29 = sadd.s32 4294967295, %s1901_s28   ;;  %s1901_s28 = sphi %s1959_s28, %s26_s28   ;;  %s1897_s27 = sphi %s1957_s27, %s2953_s27   ;;  %s1893_s26 = sphi %s1955_s26, %s2952_s26   ;;  %s1889_s25 = sphi %s1953_s25, %s2951_s25   ;;  %s1885_s24 = sphi %s1951_s24, %s2950_s24   ;;  %s1881_s23 = sphi %s1949_s23, %s2958_s23   ;;  %s1877_s22 = sphi %s1947_s22, %s2957_s22   ;;  %s1873_s21 = sphi %s1945_s21, %s2956_s21   ;;  %s1869_s20 = sphi %s1943_s20, %s2955_s20   ;;  %s1865_s19 = sphi %s1941_s19, %s2954_s19   ;;  %s1861_s18 = sphi %s1939_s18, %s2947_s18   ;;  %s1857_s17 = sphi %s1937_s17, %s2946_s17   ;;  %s1853_s16 = sphi %s1935_s16, %s2945_s16   ;;  %s1849_s15 = sphi %s1933_s15, %s2944_s15  }
  0x11   : > { %2846 = sst [smem:[#allocation20_spill]] %s1853_s16  ;;  %s35_s5 = sadd.s32 1, %s1893_s26 }
  0x12   : > { %2847 = sst [smem:[#allocation21_spill]] %s1857_s17  ;;  %s38_s6 = sadd.s32 1, %s1897_s27 }
  0x13   : > { %2848 = sst [smem:[#allocation22_spill]] %s1865_s19  ;;  %p36_p0 = scmp.ge.s32.totalorder %s35_s5, 2 }
  0x14   : > { %2849 = sst [smem:[#allocation23_spill]] %s1885_s24  ;;  %s1316_s7 = sshll.u32 %s1897_s27, 1 }
  0x15   : > { %2850 = sst [smem:[#allocation24_spill]] %s1889_s25  ;;  %s2011_s8 = sadd.s32 %s1893_s26, %s1316_s7 }
  0x16   : > { %2851 = sst [smem:[#allocation25_spill]] %s1893_s26  ;;  %s53_s9 = sadd.s32 1, %s1881_s23 }
  0x17   : > { %2852 = sst [smem:[#allocation26_spill]] %s1897_s27  ;;  %s2960_s5 = smov (%p36_p0, %s35_s5), 0 }
  0x18   : > { %2853 = sst [smem:[#allocation27_spill]] %s2960_s5  ;;  %s2962_s6 = smov (!%p36_p0, %s38_s6), %s1897_s27 }
  0x19   : > { %p44_p1 = scmp.lt.s32.totalorder %s2011_s8, 2  ;;  %p60_p2 = scmp.ne.s32.totalorder %s1881_s23, %s1877_s22 }
  0x1a   : > { %p40_p3 = scmp.ge.s32.totalorder %s2962_s6, 2  ;;  %p61_p4 = scmp.eq.s32.totalorder %s1901_s28, 0 }
  0x1b   : > { %s2022_s10 = scalar_select %p44_p1, %s2011_s8, 2 }
  0x1c   : > { %s2964_s6 = smov (%p40_p3, %s2962_s6), 0  ;;  %p2028_p5 = por %p61_p4, %p60_p2 }
  0x1d   : > { %2854 = sst [smem:[#allocation28_spill]] %s2964_s6  ;;  %p66_p6 = scmp.ne.s32.totalorder %s1877_s22, %s1873_s21 }
  0x1e   : > { %s1317_s12 = sshll.u32 %s2964_s6, 1  ;;  %p67_p7 = scmp.eq.s32.totalorder %s2004_s29, 0 }
  0x1f   : > { %s47_s13 = sadd.s32 %s1317_s12, %s2960_s5  ;;  %s117_s14 = sadd.s32 1, %s1869_s20 }
  0x20   : > { %p48_p8 = scmp.lt.s32.totalorder %s47_s13, 2  ;;  %p2040_p9 = por %p67_p7, %p66_p6 }
  0x21   : > { %s114_s30 = ssub.s32 %s2011_s8, %s47_s13  ;;  %p124_p10 = scmp.ne.s32.totalorder %s1869_s20, %s1865_s19 }
  0x22   : > { %s2966_s13 = smov (!%p48_p8, %s47_s13), 2  ;;  %p115_p11 = scmp.eq.s32.totalorder %s114_s30, 0 }
  0x23   : > { %p2049_p12 = por %p124_p10, %p61_p4  ;;  %s50_s12 = ssub.s32 %s2022_s10, %s2966_s13 }
  0x24   : > { %p130_p13 = scmp.ne.s32.totalorder %s1865_s19, %s1861_s18  ;;  %p51_p0 = scmp.eq.s32.totalorder %s50_s12, 0 }
  0x25   : > { %s170_s5 = ssub.s32 %s1897_s27, %s2964_s6  ;;  %s173_s30 = sadd.s32 1, %s1857_s17 }
  0x26   : > { %s2059_s26 = scalar_select %p115_p11, %s1869_s20, %s117_s14  }
  0x27   : > { %s2062_s4 = scalar_select %p51_p0, %s1881_s23, %s53_s9  }
  0x28   : > { %2858 = sst [smem:[#allocation29_spill]] %s2059_s26  ;;  %p2066_p1 = por %p130_p13, %p67_p7 }
  0x29   : > { %2859 = sst [smem:[#allocation30_spill]] %s2062_s4  ;;  %p171_p2 = scmp.eq.s32.totalorder %s170_s5, 0 }
  0x2a   : > { %s2860_s25 = scalar_select %p2066_p1, 1, 0 }
  0x2b   : > { %p183_p3 = scmp.ne.s32.totalorder %s1857_s17, %s1853_s16  ;;  %p184_p4 = scmp.eq.s32.totalorder %s2004_s29, 3 }
  0x2c   : > { %2861 = sst [smem:[#allocation31_spill]] %s2860_s25  ;;  %p189_p6 = scmp.ne.s32.totalorder %s1853_s16, %s1849_s15 }
  0x2d   : > { %s2074_s24 = scalar_select %p171_p2, %s1857_s17, %s173_s30  }
  0x2e   : > { %s2863_s13 = sadd.s32 4294967294, %s1901_s28   ;;  %p2081_p10 = por %p184_p4, %p183_p3 }
  0x2f   : > { %2862 = sst [smem:[#allocation32_spill]] %s2074_s24  ;;  %p190_p8 = scmp.eq.s32.totalorder %s2863_s13, 3 }
  0x30   : > { %s2864_s18 = scalar_select %p2081_p10, 1, 0 }
  0x31   : > { %p2085_p11 = por %p190_p8, %p189_p6  ;;  %p1325_p7 = scmp.ge.s32.totalorder %s1901_s28, 4 }
  0x32   : > { %2865 = sst [smem:[#allocation33_spill]] %s2864_s18 }
  0x33   : > { %s2866_s9 = scalar_select %p2085_p11, 1, 0 }
  0x34   : > { %206 = sbr.rel (%p1325_p7) target bundleno = 126 (0x7e), region = 16 }
  0x35   : > { %2867 = sst [smem:[#allocation34_spill]] %s2866_s9 }
  0x39   : > { %209 = sbr.rel (!%p2028_p5) target bundleno = 83 (0x53), region = 20  ;;  %s210_s5 = sand.u32 (%p2028_p5), 1, %s1881_s23  }
  0x3a   : > { %s1328_s14 = sshll.u32 (%p2028_p5), %s2022_s10, 3  ;;  %s1326_s12 = sshll.u32 (%p2028_p5), %s210_s5, 7 }
  0x3b   : > { %s220_s30 = ssub.s32 (%p2028_p5), 20, %s1328_s14  ;;  %s2097_s4 = scalar_lea.sflag (%p2028_p5), [#allocation6], %s210_s5 }
  0x3c   : > { %p221_p13 = scmp.lt.s32.totalorder (%p2028_p5), %s220_s30, 8  ;;  %s214_s26 = scalar_lea.vmem (%p2028_p5), [#allocation5], %s1326_s12 }
  0x3e   : > { %s2968_s30 = smov (!%p221_p13, %s220_s30), 8 }
  0x3f   : > { %s1329_s13 = sshll.u32 %s2968_s30, 4 }
  0x40   : > { %s224_s6 = ssub.s32 128, %s1329_s13 }
  0x41   : > { %s225_s27 = sshll.u32 %s224_s6, 4 }
  0x42   : > { %226 = vsyncadd %s2097_s4, %s225_s27  ;;  %p2100_p0 = scmp.ne.s32.totalorder %s1329_s13, 0  ;;  %s1356_s14 = sshll.u32 %s2022_s10, 6 }
  0x43   : > { %s229_s15 = scalar_lea.hbm %s2819_s0, %s1356_s14  ;;  %s1332_s18 = sshll.u32 %s2968_s30, 3 }
  0x44   : > { %s232_s6 = sshll.u32 %s229_s15, 4  ;;  %s234_s5 = sshll.u32 %s214_s26, 4  ;;  %s233_s6 = int_to_ptr.hbm [resolvable:$true] %s232_s6  ;;  %s235_s5 = int_to_ptr.vmem [resolvable:$true] %s234_s5 }
  0x45   : > { %s1358_s12 = sshll.u32 %s2968_s30, 8  ;;  %s1628_s16 = sshra.s32 %s235_s5, 4  ;;  %s1629_s16 = int_to_ptr.vmem [resolvable:$true] %s1628_s16 }
  0x46   : > { %s1611_s27 = sshrl.u32 %s1358_s12, 4  ;;  %s1903_s13 = smov [#allocation5]  }
  0x47   : > { %s1635_s25 = scalar_lea.vmem %s1629_s16, %s1611_s27  ;;  %s1639_s19 = scalar_lea.vmem %s1903_s13, 256 }
  0x48   : > { %p1636_p2 = scmp.ne.s32.totalorder %s1629_s16, %s1635_s25  ;;  %p1641_p6 = scmp.lt.s32.totalorder %s1639_s19, %s1635_s25 }
  0x4a   : > { %p1637_p3 = pnand %p1636_p2, %p2100_p0 }
  0x4c   : > { %p1638_p4 = pneg %p1637_p3 }
  0x4e   : > { %p1643_p8 = pnand %p1641_p6, %p1638_p4 }
  0x50   : > { %1646 = shalt.err (!%p1643_p8)
}
  0x51   : > { %s1904_s17 = smov 2560   ;;  %s1905_s15 = smov 1024  }
  0x52   : > { %240 = dma.hbm_to_vmem [thread:$0]  (%p2100_p0), %s233_s6, %s1358_s12, %s235_s5, %s2097_s4, %s1904_s17, %s1905_s15, %s1332_s18  }
  0x53 PF: > { %243 = sbr.rel (!%p2028_p5) target bundleno = 117 (0x75), region = 24  ;;  %s244_s16 = sand.u32 (%p2028_p5), 1, %s1901_s28  }
  0x54   : > { %s246_s26 = sand.u32 (%p2028_p5), 1, %s1881_s23   ;;  %s1337_s30 = sshll.u32 (%p2028_p5), %s2022_s10, 3 }
  0x55   : > { %s1335_s9 = sshll.u32 (%p2028_p5), %s246_s26, 3  ;;  %s254_s19 = ssub.s32 (%p2028_p5), 20, %s1337_s30 }
  0x56   : > { %p255_p7 = scmp.lt.s32.totalorder (%p2028_p5), %s254_s19, 8  ;;  %s2123_s24 = scalar_lea.sflag (%p2028_p5), [#allocation9], %s244_s16 }
  0x57   : > { %s248_s4 = scalar_lea.vmem (%p2028_p5), [#allocation8], %s1335_s9 }
  0x58   : > { %s2970_s19 = smov (!%p255_p7, %s254_s19), 8 }
  0x59   : > { %s257_s25 = ssub.s32 8, %s2970_s19 }
  0x5a   : > { %s258_s14 = sshll.u32 %s257_s25, 4 }
  0x5b   : > { %259 = vsyncadd %s2123_s24, %s258_s14  ;;  %p1338_p5 = scmp.ne.s32.totalorder %s2970_s19, 0  ;;  %s261_s10 = scalar_lea.hbm %s2820_s1, %s1337_s30 }
  0x5c   : > { %s262_s6 = sshll.u32 %s2970_s19, 4  ;;  %s263_s5 = sshll.u32 %s261_s10, 4  ;;  %s264_s5 = int_to_ptr.hbm [resolvable:$true] %s263_s5 }
  0x5d   : > { %s265_s12 = sshll.u32 %s248_s4, 4  ;;  %s1648_s27 = sshra.s32 %s264_s5, 4  ;;  %s266_s12 = int_to_ptr.vmem [resolvable:$true] %s265_s12  ;;  %s1649_s27 = int_to_ptr.hbm [resolvable:$true] %s1648_s27 }
  0x5e   : > { %s1650_s13 = sshrl.u32 %s262_s6, 4  ;;  %s1659_s26 = scalar_lea.hbm %s2820_s1, 20 }
  0x5f   : > { %s1655_s17 = scalar_lea.hbm %s1649_s27, %s1650_s13 }
  0x60   : > { %p1656_p13 = scmp.ne.s32.totalorder %s1649_s27, %s1655_s17  ;;  %p1661_p3 = scmp.lt.s32.totalorder %s1659_s26, %s1655_s17 }
  0x62   : > { %p1657_p0 = pnand %p1656_p13, %p1338_p5 }
  0x64   : > { %p1658_p2 = pneg %p1657_p0 }
  0x66   : > { %p1663_p4 = pnand %p1661_p3, %p1658_p2 }
  0x68   : > { %1666 = shalt.err (!%p1663_p4)
}
  0x69   : > { %s1667_s9 = sshra.s32 %s266_s12, 4  ;;  %s1906_s25 = smov [#allocation8]   ;;  %s1668_s9 = int_to_ptr.vmem [resolvable:$true] %s1667_s9 }
  0x6a   : > { %s1674_s30 = scalar_lea.vmem %s1668_s9, %s1650_s13  ;;  %s1678_s14 = scalar_lea.vmem %s1906_s25, 16 }
  0x6b   : > { %p1675_p6 = scmp.ne.s32.totalorder %s1668_s9, %s1674_s30  ;;  %p1680_p11 = scmp.lt.s32.totalorder %s1678_s14, %s1674_s30 }
  0x6d   : > { %p1676_p8 = pnand %p1675_p6, %p1338_p5 }
  0x6f   : > { %p1677_p7 = pneg %p1676_p8 }
  0x71   : > { %p1682_p13 = pnand %p1680_p11, %p1677_p7 }
  0x73   : > { %1685 = shalt.err (!%p1682_p13)
}
  0x74   : > { %268 = dma.hbm_to_vmem [thread:$0]  (%p1338_p5), %s264_s5, %s262_s6, %s266_s12, %s2123_s24  }
  0x75 PF: > { %s272_s4 = sand.u32 1, %s1901_s28   ;;  %s274_s11 = sand.u32 1, %s1869_s20  }
  0x76   : > { %s1339_s18 = sshll.u32 %s274_s11, 3  ;;  %s1341_s10 = sshll.u32 %s2011_s8, 3 }
  0x77   : > { %s282_s17 = scalar_lea.hbm %s2821_s2, %s1341_s10  ;;  %s276_s15 = scalar_lea.vmem [#allocation10], %s1339_s18 }
  0x78   : > { %s286_s16 = sshll.u32 %s276_s15, 4  ;;  %s284_s26 = sshll.u32 %s282_s17, 4  ;;  %s287_s16 = int_to_ptr.vmem [resolvable:$true] %s286_s16  ;;  %s285_s26 = int_to_ptr.hbm [resolvable:$true] %s284_s26 }
  0x79   : > { %s273_s19 = scalar_lea.sflag [#allocation9], %s272_s4  ;;  %s303_s5 = scalar_lea.hbm %s2822_s3, %s1341_s10 }
  0x7a   : > { %1365 = dma.hbm_to_vmem [thread:$0]  (%p2049_p12), %s285_s26, 128, %s287_s16, %s273_s19  }
  0x7b   : > { %s305_s12 = sshll.u32 %s303_s5, 4  ;;  %s297_s9 = scalar_lea.vmem [#allocation11], %s1339_s18  ;;  %s306_s12 = int_to_ptr.hbm [resolvable:$true] %s305_s12 }
  0x7c   : > { %s307_s8 = sshll.u32 %s297_s9, 4  ;;  %s294_s30 = scalar_lea.sflag [#allocation12], %s274_s11  ;;  %s308_s8 = int_to_ptr.vmem [resolvable:$true] %s307_s8 }
  0x7d   : > { %1366 = dma.hbm_to_vmem [thread:$0]  (%p2049_p12), %s306_s12, 128, %s308_s8, %s294_s30  }
  0x7e PF: > { %p1345_p11 = scmp.ge.s32.totalorder %s1901_s28, 1  ;;  %p312_p5 = scmp.lt.s32.totalorder %s1901_s28, 5 }
  0x80   : > { %p313_p0 = pnand %p1345_p11, %p312_p5 }
  0x82   : > { %316 = sbr.rel (%p313_p0) target bundleno = 564 (0x234), region = 36 }
  0x87   : > { %s318_s25 = sand.u32 1, %s1877_s22  }
  0x88   : > { %s1346_s14 = sshll.u32 %s318_s25, 7  ;;  %s319_s4 = scalar_lea.sflag [#allocation6], %s318_s25 }
  0x89   : > { %s2161_s10 = scalar_lea.vmem [#allocation5], %s1346_s14 }
  0x8a   : > { %1828 = dma.done.wait (%p2040_p9), %s319_s4, 2048  }
  0x8b   : > { %1830 = vsyncadd (%p2040_p9), %s319_s4, 4294965248  ;;  %s328_s21 = sand.u32 1, %s2004_s29   ;;  %s1347_s11 = sshll.u32 %s318_s25, 3 }
  0x8c   : > { %s329_s18 = scalar_lea.sflag [#allocation9], %s328_s21  ;;  %s2168_s27 = scalar_lea.vmem [#allocation8], %s1347_s11 }
  0x8d   : > { %1832 = dma.done.wait (%p2040_p9), %s329_s18, 128  }
  0x8e   : > { %1834 = vsyncadd (%p2040_p9), %s329_s18, 4294967168  ;;  %s2869_s13 = sld [smem:[#allocation22_spill]] }
  0x94   : > { %s340_s15 = sand.u32 1, %s2869_s13  }
  0x95   : > { %s1348_s16 = sshll.u32 %s340_s15, 3 }
  0x96   : > { %s342_s26 = scalar_lea.vmem [#allocation10], %s1348_s16 }
  0x97   : > { %1836 = dma.done.wait (%p2066_p1), %s329_s18, 128  }
  0x98   : > { %1838 = vsyncadd (%p2066_p1), %s329_s18, 4294967168  ;;  %s349_s29 = scalar_lea.sflag [#allocation12], %s340_s15  ;;  %s352_s19 = scalar_lea.vmem [#allocation11], %s1348_s16 }
  0x99   : > { %1840 = dma.done.wait (%p2066_p1), %s349_s29, 128  }
  0x9a   : > { %1842 = vsyncadd (%p2066_p1), %s349_s29, 4294967168  ;;  %s2871_s7 = sld [smem:[#allocation20_spill]] }
  0x9b   : > { %s2872_s5 = sld [smem:[#allocation23_spill]] }
  0xa0   : > { %s390_s24 = sand.u32 1, %s2871_s7  }
  0xa1   : > { %s2186_s6 = scalar_lea.vmem [#allocation13], %s390_s24  ;;  %p1350_p9 = scmp.ne.s32.totalorder %s2872_s5, 0 }
  0xa3   : > { %416 = sbr.rel (%p1350_p9) target bundleno = 172 (0xac), region = 56 }
  0xa8   : > { %v1907_v0 = vmov 0.0  }
  0xa9   : > { %417 = vst [vmem:[#allocation2] sm:$0xff] %v1907_v0 }
  0xaa   : > { %418 = vst [vmem:[#allocation3] sm:$0xff] %v1907_v0 }
  0xab   : > { %419 = vst [vmem:[#allocation4] sm:$0xff] %v1907_v0 }
  0xac PF: > { %v2189_v1 = vld [vmem:[%s342_s26] sm:$0xff]  ;;  %v2191_v2 = vld [vmem:[%s352_s19] sm:$0xff]  ;;  %s2893_s12 = sld [smem:[#allocation24_spill]] }
  0xad   : > { %v423_v3 = vand.u32 2147483647, %v2189_v1  ;;  %v2196_v7 = vld [vmem:[%s2161_s10] sm:$0xff]  ;;  %v2199_v8 = vld [vmem:[%s2161_s10 + $0x8] sm:$0xff]  ;;  %v2208_v12 = vld [vmem:[%s2161_s10 + $0x10] sm:$0xff]  ;;  %s2894_s9 = sld [smem:[#allocation23_spill]] }
  0xae   : > { %v2202_v9 = vld [vmem:[%s2161_s10 + $0x40] sm:$0xff]  ;;  %v2205_v10 = vld [vmem:[%s2161_s10 + $0x48] sm:$0xff]  ;;  %v2213_v14 = vld [vmem:[%s2161_s10 + $0x18] sm:$0xff] }
  0xaf   : > { %v424_v6 = vsub.f32 0.0, %v423_v3  ;;  %v484_v13 = vmax.f32 %v2196_v7, %v2202_v9  ;;  %v2216_v15 = vld [vmem:[%s2161_s10 + $0x20] sm:$0xff]  ;;  %v2219_v16 = vld [vmem:[%s2161_s10 + $0x28] sm:$0xff]  ;;  %v491_v17 = vmax.f32 %v2199_v8, %v2205_v10  ;;  %v2224_v18 = vld [vmem:[%s2161_s10 + $0x30] sm:$0xff]  ;;  %v422_v3 = vmin.f32 %v2189_v1, 0.0 }
  0xb0   : > { %v2227_v19 = vld [vmem:[%s2161_s10 + $0x50] sm:$0xff]  ;;  %v2230_v20 = vld [vmem:[%s2161_s10 + $0x58] sm:$0xff]  ;;  %v2233_v21 = vld [vmem:[%s2161_s10 + $0x60] sm:$0xff] }
  0xb1   : > { %v425_v11 = vmul.f32 1.442695, %v424_v6  ;;  %v2236_v22 = vld [vmem:[%s2161_s10 + $0x68] sm:$0xff]  ;;  %v2239_v23 = vld [vmem:[%s2161_s10 + $0x70] sm:$0xff]  ;;  %v2242_v24 = vld [vmem:[%s2161_s10 + $0x38] sm:$0xff]  ;;  %v485_v26 = vrot.slane %v484_v13, 4  ;;  %v498_v28 = vmax.f32 %v2208_v12, %v2227_v19  ;;  %v505_v29 = vmax.f32 %v2213_v14, %v2230_v20 }
  0xb2   : > { %v435_v4 = vld [vmem:[#allocation4] sm:$0xff]  ;;  %v492_v27 = vrot.slane %v491_v17, 4  ;;  %v512_v31 = vmax.f32 %v2216_v15, %v2233_v21  ;;  %v519_v32 = vmax.f32 %v2219_v16, %v2236_v22  ;;  %v526_v33 = vmax.f32 %v2224_v18, %v2239_v23  ;;  %s1351_s8 = sshll.u32 %s2893_s12, 1 }
  0xb3   : > { %v436_v5 = vadd.f32 %v435_v4, %v2191_v2  ;;  %1493 = vpow2.f32 %v425_v11  ;;  %v2245_v25 = vld [vmem:[%s2161_s10 + $0x78] sm:$0xff]  ;;  %v486_v30 = vmax.f32 %v484_v13, %v485_v26  ;;  %v499_v36 = vrot.slane %v498_v28, 4  ;;  %s456_s30 = sadd.s32 %s2894_s9, %s1351_s8  ;;  %p1353_p12 = scmp.ne.s32.totalorder %s2894_s9, 1 }
  0xb4   : > { %v493_v35 = vmax.f32 %v491_v17, %v492_v27  ;;  %v506_v37 = vrot.slane %v505_v29, 4  ;;  %v533_v38 = vmax.f32 %v2242_v24, %v2245_v25  ;;  %v513_v41 = vrot.slane %v512_v31, 4  ;;  %s1352_s25 = sshll.u32 %s456_s30, 10 }
  0xb5   : > { %437 = vst [vmem:[#allocation4] sm:$0xff] %v436_v5  ;;  %v487_v40 = vrot.slane %v486_v30, 2  ;;  %v520_v42 = vrot.slane %v519_v32, 4  ;;  %v500_v44 = vmax.f32 %v498_v28, %v499_v36  ;;  %v527_v46 = vrot.slane %v526_v33, 4 }
  0xb6   : > { %v494_v43 = vrot.slane %v493_v35, 2  ;;  %v507_v45 = vmax.f32 %v505_v29, %v506_v37  ;;  %v514_v48 = vmax.f32 %v512_v31, %v513_v41  ;;  %v534_v57 = vrot.slane %v533_v38, 4 }
  0xb7   : > { %v488_v47 = vmax.f32 %v486_v30, %v487_v40  ;;  %v521_v49 = vmax.f32 %v519_v32, %v520_v42  ;;  %v501_v51 = vrot.slane %v500_v44, 2  ;;  %v528_v53 = vmax.f32 %v526_v33, %v527_v46 }
  0xb8   : > { %v495_v50 = vmax.f32 %v493_v35, %v494_v43  ;;  %v508_v52 = vrot.slane %v507_v45, 2  ;;  %v515_v55 = vrot.slane %v514_v48, 2  ;;  %v535_v0 = vmax.f32 %v533_v38, %v534_v57  ;;  %v431_v35 = vld [vmem:[#allocation3] sm:$0xff] }
  0xb9   : > { %v1494_v34 = vpop.eup %1493  ;;  %v489_v54 = vrot.slane %v488_v47, 1  ;;  %v522_v56 = vrot.slane %v521_v49, 2  ;;  %v502_v59 = vmax.f32 %v500_v44, %v501_v51  ;;  %v529_v61 = vrot.slane %v528_v53, 2 }
  0xba   : > { %v427_v39 = vadd.f32 1.0, %v1494_v34  ;;  %v496_v58 = vrot.slane %v495_v50, 1  ;;  %v509_v60 = vmax.f32 %v507_v45, %v508_v52  ;;  %v516_v62 = vmax.f32 %v514_v48, %v515_v55 }
  0xbb   : > { %v523_v63 = vmax.f32 %v521_v49, %v522_v56  ;;  %v503_v4 = vrot.slane %v502_v59, 1  ;;  %v530_v6 = vmax.f32 %v528_v53, %v529_v61  ;;  %v490_v13 = vmax.f32 %v488_v47, %v489_v54 }
  0xbc   : > { %1495 = vlog2.f32 %v427_v39  ;;  %v510_v5 = vrot.slane %v509_v60, 1  ;;  %v517_v17 = vrot.slane %v516_v62, 1  ;;  %v536_v26 = vrot.slane %v535_v0, 2 }
  0xbd   : > { %v497_v28 = vmax.f32 %v495_v50, %v496_v58  ;;  %v524_v29 = vrot.slane %v523_v63, 1  ;;  %v504_v30 = vmax.f32 %v502_v59, %v503_v4  ;;  %v531_v31 = vrot.slane %v530_v6, 1 }
  0xbe   : > { %v537_v32 = vmax.f32 %v535_v0, %v536_v26  ;;  %v511_v34 = vmax.f32 %v509_v60, %v510_v5  ;;  %v518_v36 = vmax.f32 %v516_v62, %v517_v17  ;;  %v540_v1 = vsub.f32 %v2196_v7, %v490_v13 }
  0xbf   : > { %v458_v39 = vlaneseq  ;;  %v525_v40 = vmax.f32 %v523_v63, %v524_v29  ;;  %v541_v41 = vsub.f32 %v2199_v8, %v497_v28  ;;  %v532_v42 = vmax.f32 %v530_v6, %v531_v31 }
  0xc0   : > { %v538_v37 = vrot.slane %v537_v32, 1  ;;  %v542_v44 = vsub.f32 %v2208_v12, %v504_v30  ;;  %v543_v46 = vsub.f32 %v2213_v14, %v511_v34  ;;  %v544_v47 = vsub.f32 %v2216_v15, %v518_v36 }
  0xc1   : > { %v556_v48 = vmul.f32 1.442695, %v540_v1  ;;  %v2266_v49 = vand.u32 127, %v458_v39  ;;  %v545_v50 = vsub.f32 %v2219_v16, %v525_v40  ;;  %v546_v51 = vsub.f32 %v2224_v18, %v532_v42 }
  0xc2   : > { %v1496_v11 = vpop.eup %1495  ;;  %v539_v43 = vmax.f32 %v537_v32, %v538_v37  ;;  %v548_v53 = vsub.f32 %v2202_v9, %v490_v13  ;;  %v560_v54 = vmul.f32 1.442695, %v542_v44  ;;  %v549_v55 = vsub.f32 %v2205_v10, %v497_v28 }
  0xc3   : > { %v429_v27 = vmul.f32 0.6931472, %v1496_v11  ;;  %2873 = vst [vmem:[#allocation35_spill] sm:$0xff] %v2266_v49  ;;  %v550_v56 = vsub.f32 %v2227_v19, %v504_v30  ;;  %v551_v57 = vsub.f32 %v2230_v20, %v511_v34  ;;  %v562_v58 = vmul.f32 1.442695, %v543_v46 }
  0xc4   : > { %v547_v52 = vsub.f32 %v2242_v24, %v539_v43  ;;  %v552_v59 = vsub.f32 %v2233_v21, %v518_v36  ;;  %v553_v60 = vsub.f32 %v2236_v22, %v525_v40  ;;  %1497 = vpow2.f32 %v556_v48 }
  0xc5   : > { %v430_v33 = vsub.f32 %v422_v3, %v429_v27  ;;  %v564_v61 = vmul.f32 1.442695, %v544_v47  ;;  %v554_v62 = vsub.f32 %v2239_v23, %v532_v42  ;;  %v555_v63 = vsub.f32 %v2245_v25, %v539_v43 }
  0xc6   : > { %v566_v0 = vmul.f32 1.442695, %v545_v50  ;;  %v568_v3 = vmul.f32 1.442695, %v546_v51  ;;  %v570_v4 = vmul.f32 1.442695, %v547_v52 }
  0xc7   : > { %v432_v38 = vmul.f32 %v430_v33, %v2191_v2  ;;  %v558_v2 = vmul.f32 1.442695, %v541_v41  ;;  %v572_v6 = vmul.f32 1.442695, %v548_v53  ;;  %v574_v11 = vmul.f32 1.442695, %v549_v55 }
  0xc8   : > { %v576_v13 = vmul.f32 1.442695, %v550_v56  ;;  %v578_v17 = vmul.f32 1.442695, %v551_v57  ;;  %v580_v26 = vmul.f32 1.442695, %v552_v59 }
  0xc9   : > { %v433_v45 = vadd.f32 %v432_v38, %v431_v35  ;;  %1499 = vpow2.f32 %v558_v2  ;;  %v582_v27 = vmul.f32 1.442695, %v553_v60  ;;  %v584_v28 = vmul.f32 1.442695, %v554_v62 }
  0xca   : > { %1501 = vpow2.f32 %v560_v54  ;;  %v586_v29 = vmul.f32 1.442695, %v555_v63  ;;  %v2281_v31 = vpop.eup %1497  ;;  %v604_v39 = vand.u32 2147483647, %v2196_v7  ;;  %v605_v40 = vand.u32 2147483647, %v2199_v8 }
  0xcb   : > { %434 = vst [vmem:[#allocation3] sm:$0xff] %v433_v45  ;;  %1503 = vpow2.f32 %v562_v58  ;;  %v606_v41 = vand.u32 2147483647, %v2208_v12  ;;  %v607_v45 = vand.u32 2147483647, %v2213_v14 }
  0xcc   : > { %1505 = vpow2.f32 %v564_v61  ;;  %v608_v48 = vand.u32 2147483647, %v2216_v15  ;;  %v609_v50 = vand.u32 2147483647, %v2219_v16  ;;  %v610_v51 = vand.u32 2147483647, %v2224_v18 }
  0xcd   : > { %1507 = vpow2.f32 %v566_v0  ;;  %v611_v52 = vand.u32 2147483647, %v2242_v24  ;;  %v612_v53 = vand.u32 2147483647, %v2202_v9  ;;  %v613_v55 = vand.u32 2147483647, %v2205_v10 }
  0xce   : > { %1509 = vpow2.f32 %v568_v3  ;;  %v620_v56 = vsub.f32 0.0, %v604_v39  ;;  %v621_v57 = vsub.f32 0.0, %v605_v40  ;;  %v622_v58 = vsub.f32 0.0, %v606_v41 }
  0xcf   : > { %v2286_v35 = vpop.eup %1499  ;;  %1511 = vpow2.f32 %v572_v6  ;;  %v614_v60 = vand.u32 2147483647, %v2227_v19  ;;  %v615_v61 = vand.u32 2147483647, %v2230_v20  ;;  %v623_v62 = vsub.f32 0.0, %v607_v45 }
  0xd0   : > { %v2291_v38 = vpop.eup %1501  ;;  %1513 = vpow2.f32 %v574_v11  ;;  %v616_v0 = vand.u32 2147483647, %v2233_v21  ;;  %v617_v3 = vand.u32 2147483647, %v2236_v22  ;;  %v618_v11 = vand.u32 2147483647, %v2239_v23 }
  0xd1   : > { %v2296_v42 = vpop.eup %1503  ;;  %1515 = vpow2.f32 %v570_v4  ;;  %v624_v4 = vsub.f32 0.0, %v608_v48  ;;  %v636_v39 = vmul.f32 1.442695, %v620_v56  ;;  %v638_v40 = vmul.f32 1.442695, %v621_v57 }
  0xd2   : > { %v2301_v46 = vpop.eup %1505  ;;  %1517 = vpow2.f32 %v576_v13  ;;  %v625_v13 = vsub.f32 0.0, %v609_v50  ;;  %v640_v41 = vmul.f32 1.442695, %v622_v58  ;;  %v642_v47 = vmul.f32 1.442695, %v623_v62 }
  0xd3   : > { %v2306_v2 = vpop.eup %1507  ;;  %1519 = vpow2.f32 %v578_v17  ;;  %v626_v17 = vsub.f32 0.0, %v610_v51  ;;  %v619_v44 = vand.u32 2147483647, %v2245_v25  ;;  %v628_v50 = vsub.f32 0.0, %v612_v53 }
  0xd4   : > { %v2311_v54 = vpop.eup %1509  ;;  %1521 = vpow2.f32 %v580_v26  ;;  %v644_v51 = vmul.f32 1.442695, %v624_v4  ;;  %v630_v56 = vsub.f32 0.0, %v614_v60  ;;  %v646_v57 = vmul.f32 1.442695, %v625_v13 }
  0xd5   : > { %v2314_v59 = vpop.eup %1511  ;;  %1523 = vpow2.f32 %v582_v27  ;;  %v627_v27 = vsub.f32 0.0, %v611_v52  ;;  %v631_v52 = vsub.f32 0.0, %v615_v61  ;;  %v632_v62 = vsub.f32 0.0, %v616_v0 }
  0xd6   : > { %v2318_v63 = vpop.eup %1513  ;;  %1525 = vpow2.f32 %v584_v28  ;;  %v820_v48 = vadd.f32 %v2314_v59, %v2281_v31  ;;  %v648_v1 = vmul.f32 1.442695, %v626_v17  ;;  %v652_v4 = vmul.f32 1.442695, %v628_v50 }
  0xd7   : > { %v2322_v6 = vpop.eup %1515  ;;  %1527 = vpow2.f32 %v586_v29  ;;  %v827_v28 = vadd.f32 %v2318_v63, %v2286_v35  ;;  %v629_v29 = vsub.f32 0.0, %v613_v55  ;;  %v650_v36 = vmul.f32 1.442695, %v627_v27 }
  0xd8   : > { %v2325_v26 = vpop.eup %1517  ;;  %1529 = vpow2.f32 %v636_v39  ;;  %v821_v34 = vrot.slane %v820_v48, 4  ;;  %v633_v61 = vsub.f32 0.0, %v617_v3  ;;  %v635_v33 = vsub.f32 0.0, %v619_v44 }
  0xd9   : > { %v2327_v45 = vpop.eup %1519  ;;  %1531 = vpow2.f32 %v638_v40  ;;  %v828_v53 = vrot.slane %v827_v28, 4  ;;  %v834_v55 = vadd.f32 %v2325_v26, %v2291_v38  ;;  %v654_v0 = vmul.f32 1.442695, %v629_v29 }
  0xda   : > { %v2334_v43 = vpop.eup %1521  ;;  %1533 = vpow2.f32 %v640_v41  ;;  %v841_v60 = vadd.f32 %v2327_v45, %v2296_v42  ;;  %v822_v13 = vadd.f32 %v821_v34, %v820_v48  ;;  %v634_v40 = vsub.f32 0.0, %v618_v11 }
  0xdb   : > { %v2336_v58 = vpop.eup %1523  ;;  %1535 = vpow2.f32 %v642_v47  ;;  %v656_v47 = vmul.f32 1.442695, %v630_v56  ;;  %v829_v41 = vadd.f32 %v828_v53, %v827_v28  ;;  %v835_v50 = vrot.slane %v834_v55, 4 }
  0xdc   : > { %2874 = vst [vmem:[#allocation36_spill] sm:$0xff] %v2336_v58  ;;  %v2338_v37 = vpop.eup %1525  ;;  %1537 = vpow2.f32 %v644_v51  ;;  %v658_v51 = vmul.f32 1.442695, %v631_v52  ;;  %v660_v5 = vmul.f32 1.442695, %v632_v62  ;;  %v842_v49 = vrot.slane %v841_v60, 4 }
  0xdd   : > { %v2340_v39 = vpop.eup %1527  ;;  %1539 = vpow2.f32 %v646_v57  ;;  %v662_v29 = vmul.f32 1.442695, %v633_v61  ;;  %v823_v34 = vrot.slane %v822_v13, 2  ;;  %v830_v44 = vrot.slane %v829_v41, 2 }
  0xde   : > { %v1530_v17 = vpop.eup %1529  ;;  %1541 = vpow2.f32 %v648_v1  ;;  %v848_v1 = vadd.f32 %v2334_v43, %v2301_v46  ;;  %v666_v56 = vmul.f32 1.442695, %v635_v33  ;;  %v836_v57 = vadd.f32 %v835_v50, %v834_v55 }
  0xdf   : > { %v1532_v27 = vpop.eup %1531  ;;  %1543 = vpow2.f32 %v650_v36  ;;  %v664_v36 = vmul.f32 1.442695, %v634_v40  ;;  %v855_v52 = vadd.f32 %v2336_v58, %v2306_v2  ;;  %v843_v61 = vadd.f32 %v842_v49, %v841_v60 }
  0xe0   : > { %v1534_v32 = vpop.eup %1533  ;;  %1545 = vpow2.f32 %v652_v4  ;;  %v668_v4 = vadd.f32 1.0, %v1530_v17  ;;  %v669_v30 = vadd.f32 1.0, %v1532_v27  ;;  %v2353_v48 = vadd.f32 %v823_v34, %v822_v13 }
  0xe1   : > { %v1536_v3 = vpop.eup %1535  ;;  %1547 = vpow2.f32 %v654_v0  ;;  %v849_v40 = vrot.slane %v848_v1, 4  ;;  %v670_v33 = vadd.f32 1.0, %v1534_v32  ;;  %v2356_v55 = vadd.f32 %v830_v44, %v829_v41 }
  0xe2   : > { %v1538_v11 = vpop.eup %1537  ;;  %1549 = vpow2.f32 %v656_v47  ;;  %v671_v58 = vadd.f32 1.0, %v1536_v3  ;;  %v837_v53 = vrot.slane %v836_v57, 2  ;;  %v844_v13 = vrot.slane %v843_v61, 2 }
  0xe3   : > { %v1540_v28 = vpop.eup %1539  ;;  %1551 = vpow2.f32 %v658_v51  ;;  %v672_v60 = vadd.f32 1.0, %v1538_v11  ;;  %v862_v44 = vadd.f32 %v2338_v37, %v2311_v54 }
  0xe4   : > { %v1542_v62 = vpop.eup %1541  ;;  %1553 = vpow2.f32 %v660_v5  ;;  %v856_v5 = vrot.slane %v855_v52, 4  ;;  %v2365_v11 = vadd.f32 %v837_v53, %v836_v57 }
  0xe5   : > { %v1544_v0 = vpop.eup %1543  ;;  %1555 = vpow2.f32 %v662_v29  ;;  %v673_v29 = vadd.f32 1.0, %v1540_v28  ;;  %v674_v41 = vadd.f32 1.0, %v1542_v62  ;;  %v2373_v62 = vadd.f32 %v2340_v39, %v2322_v6 }
  0xe6   : > { %v1546_v47 = vpop.eup %1545  ;;  %1557 = vpow2.f32 %v664_v36  ;;  %v2360_v36 = vadd.f32 %v849_v40, %v848_v1  ;;  %v675_v49 = vadd.f32 1.0, %v1544_v0  ;;  %v2369_v1 = vadd.f32 %v844_v13, %v843_v61 }
  0xe7   : > { %v1548_v50 = vpop.eup %1547  ;;  %1559 = vpow2.f32 %v666_v56  ;;  %v676_v28 = vadd.f32 1.0, %v1546_v47 }
  0xe8   : > { %v1550_v17 = vpop.eup %1549  ;;  %1561 = vlog2.f32 %v668_v4  ;;  %v2367_v4 = vadd.f32 %v856_v5, %v855_v52  ;;  %2875 = vst [vmem:[#allocation37_spill] sm:$0xff] %v2369_v1  ;;  %v863_v52 = vrot.slane %v862_v44, 4 }
  0xe9   : > { %v1552_v27 = vpop.eup %1551  ;;  %1563 = vlog2.f32 %v669_v30  ;;  %v678_v3 = vadd.f32 1.0, %v1550_v17 }
  0xea   : > { %v1554_v32 = vpop.eup %1553  ;;  %1565 = vlog2.f32 %v670_v33  ;;  %v677_v33 = vadd.f32 1.0, %v1548_v50  ;;  %v679_v57 = vadd.f32 1.0, %v1552_v27  ;;  %v870_v50 = vrot.slane %v2373_v62, 4 }
  0xeb   : > { %v1556_v56 = vpop.eup %1555  ;;  %1567 = vlog2.f32 %v671_v58  ;;  %v680_v53 = vadd.f32 1.0, %v1554_v32  ;;  %v2876_v27 = vmax.f32 %v2196_v7, 0.0  ;;  %v2879_v7 = vmax.f32 %v2213_v14, 0.0 }
  0xec   : > { %v1558_v30 = vpop.eup %1557  ;;  %1569 = vlog2.f32 %v672_v60  ;;  %v681_v47 = vadd.f32 1.0, %v1556_v56  ;;  %v2882_v14 = vmax.f32 %v2224_v18, 0.0 }
  0xed   : > { %v1560_v40 = vpop.eup %1559  ;;  %1571 = vlog2.f32 %v673_v29  ;;  %v682_v34 = vadd.f32 1.0, %v1558_v30 }
  0xee   : > { %v1562_v58 = vpop.eup %1561  ;;  %1573 = vlog2.f32 %v674_v41  ;;  %v683_v29 = vadd.f32 1.0, %v1560_v40 }
  0xef   : > { %v1564_v5 = vpop.eup %1563  ;;  %v685_v60 = vmul.f32 0.6931472, %v1562_v58  ;;  %1575 = vlog2.f32 %v675_v49  ;;  %v2877_v49 = vmax.f32 %v2199_v8, 0.0  ;;  %v2382_v58 = vadd.f32 %v863_v52, %v862_v44 }
  0xf0   : > { %v1566_v13 = vpop.eup %1565  ;;  %v687_v51 = vmul.f32 0.6931472, %v1564_v5  ;;  %1577 = vlog2.f32 %v676_v28  ;;  %v2878_v28 = vmax.f32 %v2208_v12, 0.0  ;;  %v2880_v8 = vmax.f32 %v2216_v15, 0.0 }
  0xf1   : > { %v1568_v17 = vpop.eup %1567  ;;  %v689_v0 = vmul.f32 0.6931472, %v1566_v13  ;;  %1579 = vlog2.f32 %v677_v33  ;;  %v716_v32 = vadd.f32 %v685_v60, %v2876_v27  ;;  %v2881_v12 = vmax.f32 %v2219_v16, 0.0 }
  0xf2   : > { %v1570_v41 = vpop.eup %1569  ;;  %v691_v1 = vmul.f32 0.6931472, %v1568_v17  ;;  %1581 = vlog2.f32 %v678_v3  ;;  %v717_v56 = vadd.f32 %v687_v51, %v2877_v49  ;;  %v2883_v15 = vmax.f32 %v2242_v24, 0.0 }
  0xf3   : > { %v1572_v30 = vpop.eup %1571  ;;  %v693_v5 = vmul.f32 0.6931472, %v1570_v41  ;;  %1583 = vlog2.f32 %v679_v57  ;;  %v718_v61 = vadd.f32 %v689_v0, %v2878_v28  ;;  %v732_v40 = vsub.f32 0.0, %v716_v32 }
  0xf4   : > { %v1574_v13 = vpop.eup %1573  ;;  %v695_v33 = vmul.f32 0.6931472, %v1572_v30  ;;  %1585 = vlog2.f32 %v680_v53  ;;  %v719_v60 = vadd.f32 %v691_v1, %v2879_v7  ;;  %v733_v17 = vsub.f32 0.0, %v717_v56 }
  0xf5   : > { %v1576_v3 = vpop.eup %1575  ;;  %v697_v27 = vmul.f32 0.6931472, %v1574_v13  ;;  %1587 = vlog2.f32 %v681_v47  ;;  %v720_v51 = vadd.f32 %v693_v5, %v2880_v8  ;;  %v734_v44 = vsub.f32 0.0, %v718_v61 }
  0xf6   : > { %v1578_v52 = vpop.eup %1577  ;;  %v699_v57 = vmul.f32 0.6931472, %v1576_v3  ;;  %1589 = vlog2.f32 %v682_v34  ;;  %v721_v0 = vadd.f32 %v695_v33, %v2881_v12  ;;  %v735_v32 = vsub.f32 0.0, %v719_v60 }
  0xf7   : > { %v1580_v41 = vpop.eup %1579  ;;  %v701_v53 = vmul.f32 0.6931472, %v1578_v52  ;;  %1591 = vlog2.f32 %v683_v29  ;;  %v722_v1 = vadd.f32 %v697_v27, %v2882_v14  ;;  %v736_v49 = vsub.f32 0.0, %v720_v51 }
  0xf8   : > { %v1582_v56 = vpop.eup %1581  ;;  %v703_v47 = vmul.f32 0.6931472, %v1580_v41  ;;  %v723_v30 = vadd.f32 %v699_v57, %v2883_v15  ;;  %v737_v61 = vsub.f32 0.0, %v721_v0  ;;  %v748_v5 = vmul.f32 %v2281_v31, %v732_v40 }
  0xf9   : > { %v1584_v34 = vpop.eup %1583  ;;  %v705_v28 = vmul.f32 0.6931472, %v1582_v56  ;;  %v2884_v16 = vmax.f32 %v2202_v9, 0.0  ;;  %v738_v33 = vsub.f32 0.0, %v722_v1  ;;  %v749_v29 = vmul.f32 %v2286_v35, %v733_v17 }
  0xfa   : > { %v1586_v7 = vpop.eup %1585  ;;  %v707_v18 = vmul.f32 0.6931472, %v1584_v34  ;;  %v2885_v60 = vmax.f32 %v2205_v10, 0.0  ;;  %v739_v27 = vsub.f32 0.0, %v723_v30  ;;  %v750_v24 = vmul.f32 %v2291_v38, %v734_v44 }
  0xfb   : > { %v724_v13 = vadd.f32 %v701_v53, %v2884_v16  ;;  %v1588_v8 = vpop.eup %1587  ;;  %v709_v51 = vmul.f32 0.6931472, %v1586_v7  ;;  %v2886_v31 = vmax.f32 %v2227_v19, 0.0  ;;  %v751_v9 = vmul.f32 %v2296_v42, %v735_v32 }
  0xfc   : > { %v725_v3 = vadd.f32 %v703_v47, %v2885_v60  ;;  %v1590_v57 = vpop.eup %1589  ;;  %v711_v12 = vmul.f32 0.6931472, %v1588_v8  ;;  %v2887_v35 = vmax.f32 %v2230_v20, 0.0  ;;  %v752_v10 = vmul.f32 %v2301_v46, %v736_v49 }
  0xfd   : > { %v726_v40 = vadd.f32 %v705_v28, %v2886_v31  ;;  %v740_v52 = vsub.f32 0.0, %v724_v13  ;;  %v1592_v41 = vpop.eup %1591  ;;  %v713_v53 = vmul.f32 0.6931472, %v1590_v57  ;;  %v2888_v38 = vmax.f32 %v2233_v21, 0.0 }
  0xfe   : > { %v727_v17 = vadd.f32 %v707_v18, %v2887_v35  ;;  %v741_v0 = vsub.f32 0.0, %v725_v3  ;;  %v753_v19 = vmul.f32 %v2306_v2, %v737_v61  ;;  %v715_v1 = vmul.f32 0.6931472, %v1592_v41 }
  0xff   : > { %v728_v44 = vadd.f32 %v709_v51, %v2888_v38  ;;  %v742_v14 = vsub.f32 0.0, %v726_v40  ;;  %v2889_v56 = vmax.f32 %v2236_v22, 0.0  ;;  %v754_v47 = vmul.f32 %v2311_v54, %v738_v33  ;;  %v2892_v33 = vld [vmem:[#allocation36_spill] sm:$0xff] }
 0x100   : > { %v743_v32 = vsub.f32 0.0, %v727_v17  ;;  %v2890_v20 = vmax.f32 %v2239_v23, 0.0  ;;  %v755_v46 = vmul.f32 %v2322_v6, %v739_v27  ;;  %v756_v49 = vmul.f32 %v2314_v59, %v740_v52 }
 0x101   : > { %v729_v42 = vadd.f32 %v711_v12, %v2889_v56  ;;  %v744_v30 = vsub.f32 0.0, %v728_v44  ;;  %v2891_v21 = vmax.f32 %v2245_v25, 0.0  ;;  %v757_v2 = vmul.f32 %v2318_v63, %v741_v0 }
 0x102   : > { %v730_v15 = vadd.f32 %v713_v53, %v2890_v20  ;;  %v758_v22 = vmul.f32 %v2325_v26, %v742_v14  ;;  %v759_v16 = vmul.f32 %v2327_v45, %v743_v32  ;;  %v764_v23 = vadd.f32 %v756_v49, %v748_v5 }
 0x103   : > { %v731_v34 = vadd.f32 %v715_v1, %v2891_v21  ;;  %v745_v28 = vsub.f32 0.0, %v729_v42  ;;  %v760_v54 = vmul.f32 %v2334_v43, %v744_v30  ;;  %v771_v6 = vadd.f32 %v757_v2, %v749_v29 }
 0x104   : > { %v746_v61 = vsub.f32 0.0, %v730_v15  ;;  %v778_v18 = vadd.f32 %v758_v22, %v750_v24  ;;  %v765_v25 = vrot.slane %v764_v23, 4  ;;  %v785_v60 = vadd.f32 %v759_v16, %v751_v9 }
 0x105   : > { %v747_v13 = vsub.f32 0.0, %v731_v34  ;;  %v761_v7 = vmul.f32 %v2892_v33, %v745_v28  ;;  %v792_v3 = vadd.f32 %v760_v54, %v752_v10  ;;  %v772_v27 = vrot.slane %v771_v6, 4 }
 0x106   : > { %v762_v59 = vmul.f32 %v2338_v37, %v746_v61  ;;  %v779_v26 = vrot.slane %v778_v18, 4  ;;  %v766_v51 = vadd.f32 %v765_v25, %v764_v23  ;;  %v786_v45 = vrot.slane %v785_v60, 4 }
 0x107   : > { %v763_v63 = vmul.f32 %v2340_v39, %v747_v13  ;;  %v799_v8 = vadd.f32 %v761_v7, %v753_v19  ;;  %v793_v31 = vrot.slane %v792_v3, 4  ;;  %v773_v5 = vadd.f32 %v772_v27, %v771_v6 }
 0x108   : > { %v806_v43 = vadd.f32 %v762_v59, %v754_v47  ;;  %v780_v40 = vadd.f32 %v779_v26, %v778_v18  ;;  %v767_v24 = vrot.slane %v766_v51, 2  ;;  %v787_v57 = vadd.f32 %v786_v45, %v785_v60 }
 0x109   : > { %v800_v52 = vrot.slane %v799_v8, 4  ;;  %v813_v29 = vadd.f32 %v763_v63, %v755_v46  ;;  %v794_v37 = vadd.f32 %v793_v31, %v792_v3  ;;  %v774_v9 = vrot.slane %v773_v5, 2 }
 0x10a   : > { %v807_v12 = vrot.slane %v806_v43, 4  ;;  %v781_v35 = vrot.slane %v780_v40, 2  ;;  %v788_v0 = vrot.slane %v787_v57, 2  ;;  %v871_v53 = vadd.f32 %v870_v50, %v2373_v62 }
 0x10b   : > { %v801_v17 = vadd.f32 %v800_v52, %v799_v8  ;;  %v814_v39 = vrot.slane %v813_v29, 4  ;;  %v795_v10 = vrot.slane %v794_v37, 2  ;;  %v839_v14 = vrot.slane %v2365_v11, 1 }
 0x10c   : > { %v808_v41 = vadd.f32 %v807_v12, %v806_v43  ;;  %v865_v19 = vrot.slane %v2382_v58, 2  ;;  %v768_v1 = vadd.f32 %v767_v24, %v766_v51  ;;  %v2895_v42 = vrot.slane %v2360_v36, 2 }
 0x10d   : > { %v802_v38 = vrot.slane %v801_v17, 2  ;;  %v815_v44 = vadd.f32 %v814_v39, %v813_v29  ;;  %v2896_v47 = vrot.slane %v2367_v4, 2  ;;  %v775_v15 = vadd.f32 %v774_v9, %v773_v5 }
 0x10e   : > { %v809_v56 = vrot.slane %v808_v41, 2  ;;  %v852_v32 = vadd.f32 %v2895_v42, %v2360_v36  ;;  %v782_v30 = vadd.f32 %v781_v35, %v780_v40  ;;  %v789_v62 = vadd.f32 %v788_v0, %v787_v57 }
 0x10f   : > { %v859_v20 = vadd.f32 %v2896_v47, %v2367_v4  ;;  %v2897_v50 = vrot.slane %v2353_v48, 1  ;;  %v796_v49 = vadd.f32 %v795_v10, %v794_v37  ;;  %v803_v21 = vadd.f32 %v802_v38, %v801_v17  ;;  %v2899_v4 = vld [vmem:[#allocation37_spill] sm:$0xff] }
 0x110   : > { %v816_v34 = vrot.slane %v815_v44, 2  ;;  %v872_v28 = vrot.slane %v871_v53, 2  ;;  %v810_v2 = vadd.f32 %v809_v56, %v808_v41  ;;  %v2898_v36 = vrot.slane %v2356_v55, 1 }
 0x111   : > { %v2443_v46 = vadd.f32 %v2897_v50, %v2353_v48  ;;  %v846_v61 = vrot.slane %v2899_v4, 1  ;;  %v866_v16 = vadd.f32 %v865_v19, %v2382_v58  ;;  %v769_v54 = vrot.slane %v768_v1, 1 }
 0x112   : > { %v2449_v22 = vadd.f32 %v2898_v36, %v2356_v55  ;;  %v2454_v23 = vadd.f32 %v839_v14, %v2365_v11  ;;  %v853_v48 = vrot.slane %v852_v32, 1  ;;  %v860_v13 = vrot.slane %v859_v20, 1 }
 0x113   : > { %v776_v33 = vrot.slane %v775_v15, 1  ;;  %v783_v7 = vrot.slane %v782_v30, 1  ;;  %v790_v6 = vrot.slane %v789_v62, 1  ;;  %1593 = vrcp.f32 %v2443_v46 }
 0x114   : > { %v797_v18 = vrot.slane %v796_v49, 1  ;;  %v804_v59 = vrot.slane %v803_v21, 1  ;;  %v2457_v55 = vadd.f32 %v816_v34, %v815_v44  ;;  %v873_v25 = vadd.f32 %v872_v28, %v871_v53 }
 0x115   : > { %v811_v60 = vrot.slane %v810_v2, 1  ;;  %v2460_v58 = vadd.f32 %v846_v61, %v2899_v4  ;;  %v867_v3 = vrot.slane %v866_v16, 1  ;;  %1595 = vrcp.f32 %v2449_v22 }
 0x116   : > { %v2463_v11 = vstv %s1352_s25  ;;  %v2465_v63 = vadd.f32 %v769_v54, %v768_v1  ;;  %v2467_v27 = vadd.f32 %v853_v48, %v852_v32  ;;  %v2469_v26 = vadd.f32 %v860_v13, %v859_v20 }
 0x117   : > { %v2471_v8 = vadd.f32 %v776_v33, %v775_v15  ;;  %v2473_v51 = vadd.f32 %v783_v7, %v782_v30  ;;  %v2475_v45 = vadd.f32 %v790_v6, %v789_v62  ;;  %1597 = vrcp.f32 %v2454_v23  ;;  %v2929_v7 = vld [vmem:[#allocation35_spill] sm:$0xff] }
 0x118   : > { %v2478_v31 = vadd.f32 %v797_v18, %v796_v49  ;;  %v2480_v43 = vadd.f32 %v804_v59, %v803_v21  ;;  %v818_v5 = vrot.slane %v2457_v55, 1  ;;  %v874_v40 = vrot.slane %v873_v25, 1 }
 0x119   : > { %v2483_v52 = vpop.eup %1593  ;;  %v2485_v29 = vadd.f32 %v811_v60, %v810_v2  ;;  %v2487_v24 = vadd.f32 %v867_v3, %v866_v16  ;;  %v887_v57 = vand.u32 2147483648, %v2443_v46  ;;  %1599 = vrcp.f32 %v2460_v58 }
 0x11a   : > { %v877_v37 = vmul.f32 %v2483_v52, %v2443_v46  ;;  %vm881_vm0 = vweird.f32 %v2443_v46  ;;  %v885_v12 = vand.u32 2147483647, %v2443_v46  ;;  %v901_v9 = vand.u32 2147483648, %v2449_v22 }
 0x11b   : > { %v2496_v35 = vpop.eup %1595  ;;  %vm895_vm1 = vweird.f32 %v2449_v22  ;;  %v899_v17 = vand.u32 2147483647, %v2449_v22  ;;  %v915_v39 = vand.u32 2147483648, %v2454_v23  ;;  %1601 = vrcp.f32 %v2467_v27 }
 0x11c   : > { %v2502_v0 = vadd.f32 %v874_v40, %v873_v25  ;;  %v878_v10 = vsub.f32 1.0, %v877_v37  ;;  %v891_v41 = vmul.f32 %v2496_v35, %v2449_v22  ;;  %v929_v53 = vand.u32 2147483648, %v2460_v58 }
 0x11d   : > { %v2507_v38 = vpop.eup %1597  ;;  %v2509_v44 = vor.u32 1.1754944e-38, %v887_v57  ;;  %vm909_vm2 = vweird.f32 %v2454_v23  ;;  %v913_v14 = vand.u32 2147483647, %v2454_v23  ;;  %1603 = vrcp.f32 %v2469_v26 }
 0x11e   : > { %v892_v19 = vsub.f32 1.0, %v891_v41  ;;  %v2514_v1 = vor.u32 1.1754944e-38, %v901_v9  ;;  %v905_v56 = vmul.f32 %v2507_v38, %v2454_v23  ;;  %v927_v42 = vand.u32 2147483647, %v2460_v58 }
 0x11f   : > { %v2519_v32 = vpop.eup %1599  ;;  %v879_v47 = vmul.f32 %v2483_v52, %v878_v10  ;;  %vm882_vm3 = vweird.f32 %v2483_v52  ;;  %v2523_v20 = vor.u32 1.1754944e-38, %v915_v39  ;;  %vm923_vm4 = vweird.f32 %v2460_v58 }
 0x120   : > { %vm2526_vm5 = vcmp.eq.f32.partialorder %v885_v12, 8.507059e+37  ;;  %v893_v30 = vmul.f32 %v2496_v35, %v892_v19  ;;  %vm2531_vm6 = vcmp.eq.f32.partialorder %v899_v17, 8.507059e+37  ;;  %v906_v50 = vsub.f32 1.0, %v905_v56  ;;  %vm2563_vm13 = vmor %vm881_vm0, %vm882_vm3 }
 0x121   : > { %v919_v49 = vmul.f32 %v2519_v32, %v2460_v58  ;;  %v930_v21 = vor.u32 1.1754944e-38, %v929_v53  ;;  %v2537_v34 = vpop.eup %1601  ;;  %vm896_vm7 = vweird.f32 %v2496_v35  ;;  %vm2540_vm8 = vcmp.eq.f32.partialorder %v913_v14, 8.507059e+37 }
 0x122   : > { %vm937_vm9 = vweird.f32 %v2467_v27  ;;  %v941_v2 = vand.u32 2147483647, %v2467_v27  ;;  %1605 = vrcp.f32 %v2487_v24  ;;  %v907_v36 = vmul.f32 %v2507_v38, %v906_v50  ;;  %vm2575_vm15 = vmor %vm895_vm1, %vm896_vm7 }
 0x123   : > { %v920_v4 = vsub.f32 1.0, %v919_v49  ;;  %vm2548_vm10 = vcmp.eq.f32.partialorder %v927_v42, 8.507059e+37  ;;  %v943_v16 = vand.u32 2147483648, %v2467_v27  ;;  %v1604_v54 = vpop.eup %1603  ;;  %v880_v48 = vadd.f32 %v2483_v52, %v879_v47 }
 0x124   : > { %vm910_vm12 = vweird.f32 %v2507_v38  ;;  %v933_v13 = vmul.f32 %v2537_v34, %v2467_v27  ;;  %v955_v33 = vand.u32 2147483647, %v2469_v26  ;;  %v894_v6 = vadd.f32 %v2496_v35, %v893_v30 }
 0x125   : > { %v921_v18 = vmul.f32 %v2519_v32, %v920_v4  ;;  %vm924_vm14 = vweird.f32 %v2519_v32  ;;  %v947_v59 = vmul.f32 %v1604_v54, %v2469_v26  ;;  %v908_v46 = vadd.f32 %v2507_v38, %v907_v36  ;;  %vm2587_vm11 = vmor %vm909_vm2, %vm910_vm12 }
 0x126   : > { %v934_v60 = vsub.f32 1.0, %v933_v13  ;;  %vm938_vm0 = vweird.f32 %v2537_v34  ;;  %vm2581_vm3 = vcmp.eq.f32.partialorder %v941_v2, 8.507059e+37  ;;  %v944_v57 = vor.u32 1.1754944e-38, %v943_v16  ;;  %vm2594_vm7 = vmor %vm923_vm4, %vm924_vm14 }
 0x127   : > { %v922_v22 = vadd.f32 %v2519_v32, %v921_v18  ;;  %v948_v37 = vsub.f32 1.0, %v947_v59  ;;  %vm952_vm1 = vweird.f32 %v1604_v54  ;;  %v957_v23 = vand.u32 2147483648, %v2469_v26  ;;  %vm2612_vm4 = vmor %vm937_vm9, %vm938_vm0 }
 0x128   : > { %v1606_v12 = vpop.eup %1605  ;;  %v935_v17 = vmul.f32 %v2537_v34, %v934_v60  ;;  %vm965_vm2 = vweird.f32 %v2487_v24  ;;  %1607 = vrcp.f32 %v2502_v0  ;;  %v884_v39 = vsel %vm2563_vm13, %v2483_v52, %v880_v48 }
 0x129   : > { %v898_v58 = vsel %vm2575_vm15, %v2496_v35, %v894_v6  ;;  %v949_v41 = vmul.f32 %v1604_v54, %v948_v37  ;;  %v961_v53 = vmul.f32 %v1606_v12, %v2487_v24  ;;  %v912_v14 = vsel %vm2587_vm11, %v2507_v38, %v908_v46 }
 0x12a   : > { %v936_v52 = vadd.f32 %v2537_v34, %v935_v17  ;;  %vm2920_vm12 = vweird.f32 %v2469_v26  ;;  %v969_v27 = vand.u32 2147483647, %v2487_v24  ;;  %v971_v19 = vand.u32 2147483648, %v2487_v24 }
 0x12b   : > { %vm2623_vm13 = vmor %vm2920_vm12, %vm952_vm1  ;;  %v926_v56 = vsel %vm2594_vm7, %v2519_v32, %v922_v22  ;;  %v950_v42 = vadd.f32 %v1604_v54, %v949_v41  ;;  %v962_v47 = vsub.f32 1.0, %v961_v53  ;;  %vm966_vm9 = vweird.f32 %v1606_v12 }
 0x12c   : > { %v889_v38 = vsel %vm2526_vm5, %v2509_v44, %v884_v39  ;;  %v903_v26 = vsel %vm2531_vm6, %v2514_v1, %v898_v58  ;;  %vm2638_vm11 = vcmp.eq.f32.partialorder %v955_v33, 8.507059e+37  ;;  %v958_v50 = vor.u32 1.1754944e-38, %v957_v23  ;;  %vm2654_vm5 = vmor %vm965_vm2, %vm966_vm9 }
 0x12d   : > { %v917_v32 = vsel %vm2540_vm8, %v2523_v20, %v912_v14  ;;  %v940_v49 = vsel %vm2612_vm4, %v2537_v34, %v936_v52  ;;  %v954_v44 = vsel %vm2623_vm13, %v1604_v54, %v950_v42  ;;  %v963_v15 = vmul.f32 %v1606_v12, %v962_v47  ;;  %v454_v47 = vld [vmem:[%s2168_s27] sm:$0xff] }
 0x12e   : > { %v1608_v2 = vpop.eup %1607  ;;  %v931_v1 = vsel %vm2548_vm10, %v930_v21, %v926_v56  ;;  %vm2658_vm6 = vcmp.eq.f32.partialorder %v969_v27, 8.507059e+37  ;;  %v972_v28 = vor.u32 1.1754944e-38, %v971_v19  ;;  %vm979_vm8 = vweird.f32 %v2502_v0 }
 0x12f   : > { %v964_v34 = vadd.f32 %v1606_v12, %v963_v15  ;;  %v975_v36 = vmul.f32 %v1608_v2, %v2502_v0  ;;  %v983_v4 = vand.u32 2147483647, %v2502_v0  ;;  %v985_v21 = vand.u32 2147483648, %v2502_v0 }
 0x130   : > { %v945_v24 = vsel %vm2581_vm3, %v944_v57, %v940_v49  ;;  %v959_v61 = vsel %vm2638_vm11, %v958_v50, %v954_v44  ;;  %v989_v16 = vmul.f32 %v903_v26, %v2471_v8  ;;  %v990_v54 = vmul.f32 %v917_v32, %v2473_v51 }
 0x131   : > { %v968_v48 = vsel %vm2654_vm5, %v1606_v12, %v964_v34  ;;  %v976_v13 = vsub.f32 1.0, %v975_v36  ;;  %vm980_vm10 = vweird.f32 %v1608_v2  ;;  %v991_v33 = vmul.f32 %v931_v1, %v2475_v45 }
 0x132   : > { %v460_v6 = vadd.s32 128, %v2929_v7  ;;  %v461_v18 = vadd.s32 256, %v2929_v7  ;;  %v819_v59 = vadd.f32 %v818_v5, %v2457_v55  ;;  %v973_v8 = vsel %vm2658_vm6, %v972_v28, %v968_v48  ;;  %vm2687_vm14 = vmor %vm979_vm8, %vm980_vm10 }
 0x133   : > { %v977_v25 = vmul.f32 %v1608_v2, %v976_v13  ;;  %v988_v51 = vmul.f32 %v889_v38, %v2465_v63  ;;  %v992_v46 = vmul.f32 %v945_v24, %v2478_v31  ;;  %v993_v60 = vmul.f32 %v959_v61, %v2480_v43 }
 0x134   : > { %vm2691_vm15 = vcmp.eq.f32.partialorder %v983_v4, 8.507059e+37  ;;  %v986_v55 = vor.u32 1.1754944e-38, %v985_v21  ;;  %v1005_v5 = vrot.slane %v989_v16, 7  ;;  %v1006_v40 = vrot.slane %v990_v54, 6 }
 0x135   : > { %v978_v22 = vadd.f32 %v1608_v2, %v977_v25  ;;  %v994_v63 = vmul.f32 %v973_v8, %v2485_v29  ;;  %v1007_v57 = vrot.slane %v991_v33, 5  ;;  %vm1012_vm0 = vcmask 1040384  }
 0x136   : > { %v462_v31 = vadd.s32 384, %v2929_v7  ;;  %v463_v43 = vadd.s32 512, %v2929_v7  ;;  %v464_v0 = vadd.s32 640, %v2929_v7  ;;  %vm1014_vm3 = vcmask 1042434  }
 0x137   : > { %v465_v37 = vadd.s32 768, %v2929_v7  ;;  %v982_v12 = vsel %vm2687_vm14, %v1608_v2, %v978_v22  ;;  %v1008_v9 = vrot.slane %v992_v46, 4  ;;  %v1009_v17 = vrot.slane %v993_v60, 3  ;;  %v996_v46 = vld [vmem:[#allocation2] sm:$0xff] }
 0x138   : > { %v466_v23 = vadd.s32 896, %v2929_v7  ;;  %v987_v29 = vsel %vm2691_vm15, %v986_v55, %v982_v12  ;;  %v1013_v39 = vsel %vm1012_vm0, %v988_v51, %v1005_v5  ;;  %vm1018_vm1 = vcmask 1044484  }
 0x139   : > { %v995_v58 = vmul.f32 %v987_v29, %v819_v59  ;;  %v1010_v10 = vrot.slane %v994_v63, 2  ;;  %v1015_v41 = vsel %vm1014_vm3, %v1006_v40, %v1007_v57  ;;  %vm1016_vm7 = vcmask 1041408  }
 0x13a   : > { %v468_v53 = vadd.s32 %v2463_v11, %v2929_v7  ;;  %v469_v14 = vadd.s32 %v2463_v11, %v460_v6  ;;  %vm1020_vm2 = vcmask 1046534   ;;  %v470_v52 = vadd.s32 %v2463_v11, %v461_v18 }
 0x13b   : > { %v1011_v35 = vrot.slane %v995_v58, 1  ;;  %v1019_v27 = vsel %vm1018_vm1, %v1008_v9, %v1009_v17  ;;  %vm1022_vm4 = vcmask 1045508   ;;  %v471_v19 = vadd.s32 %v2463_v11, %v462_v31 }
 0x13c   : > { %v472_v56 = vadd.s32 %v2463_v11, %v463_v43  ;;  %v1017_v42 = vsel %vm1016_vm7, %v1013_v39, %v1015_v41  ;;  %vm1024_vm12 = vcmask 1043456   ;;  %v473_v38 = vadd.s32 %v2463_v11, %v464_v0 }
 0x13d   : > { %v474_v26 = vadd.s32 %v2463_v11, %v465_v37  ;;  %v475_v30 = vadd.s32 %v2463_v11, %v466_v23  ;;  %v1021_v50 = vsel %vm1020_vm2, %v1010_v10, %v1011_v35  ;;  %vm476_vm13 = vcmp.lt.s32.totalorder %v468_v53, 2500 }
 0x13e   : > { %v1023_v32 = vsel %vm1022_vm4, %v1019_v27, %v1021_v50  ;;  %vm477_vm9 = vcmp.lt.s32.totalorder %v469_v14, 2500  ;;  %vm478_vm11 = vcmp.lt.s32.totalorder %v470_v52, 2500  ;;  %vm479_vm5 = vcmp.lt.s32.totalorder %v471_v19, 2500 }
 0x13f   : > { %v1025_v49 = vsel %vm1024_vm12, %v1017_v42, %v1023_v32  ;;  %vm480_vm6 = vcmp.lt.s32.totalorder %v472_v56, 2500  ;;  %vm481_vm8 = vcmp.lt.s32.totalorder %v473_v38, 2500  ;;  %vm482_vm10 = vcmp.lt.s32.totalorder %v474_v26, 2500 }
 0x140   : > { %v1027_v44 = vmul.f32 %v1025_v49, %v454_v47  ;;  %vm483_vm14 = vcmp.lt.s32.totalorder %v475_v30, 2500 }
 0x142   : > { %v1029_v15 = vperm.slane %v1027_v44, 0  ;;  %v1030_v2 = vperm.slane %v1027_v44, 1  ;;  %v1031_v1 = vperm.slane %v1027_v44, 2  ;;  %v1032_v62 = vperm.slane %v1027_v44, 3 }
 0x143   : > { %v1033_v11 = vperm.slane %v1027_v44, 4  ;;  %v1034_v20 = vperm.slane %v1027_v44, 5  ;;  %v1035_v28 = vperm.slane %v1027_v44, 6  ;;  %v1036_v34 = vperm.slane %v1027_v44, 7 }
 0x144   : > { %v1045_v36 = vsel %vm476_vm13, %v1029_v15, 0.0  ;;  %v1046_v4 = vsel %vm477_vm9, %v1030_v2, 0.0  ;;  %v1047_v21 = vsel %vm478_vm11, %v1031_v1, 0.0  ;;  %v1048_v24 = vsel %vm479_vm5, %v1032_v62, 0.0 }
 0x145   : > { %v1049_v61 = vsel %vm480_vm6, %v1033_v11, 0.0  ;;  %v1050_v16 = vsel %vm481_vm8, %v1034_v20, 0.0  ;;  %v1051_v54 = vsel %vm482_vm10, %v1035_v28, 0.0  ;;  %v1052_v48 = vsel %vm483_vm14, %v1036_v34, 0.0 }
 0x146   : > { %v1061_v13 = vrot.slane %v1046_v4, 7  ;;  %v1062_v33 = vrot.slane %v1047_v21, 6  ;;  %v1063_v7 = vrot.slane %v1048_v24, 5  ;;  %v1064_v6 = vrot.slane %v1049_v61, 4 }
 0x147   : > { %v1065_v18 = vrot.slane %v1050_v16, 3  ;;  %v1066_v59 = vrot.slane %v1051_v54, 2  ;;  %v1067_v8 = vrot.slane %v1052_v48, 1 }
 0x148   : > { %v1068_v25 = vsel %vm1012_vm0, %v1045_v36, %v1061_v13  ;;  %v1069_v51 = vsel %vm1014_vm3, %v1062_v33, %v1063_v7 }
 0x149   : > { %v1070_v60 = vsel %vm1016_vm7, %v1068_v25, %v1069_v51  ;;  %v1071_v45 = vsel %vm1018_vm1, %v1064_v6, %v1065_v18  ;;  %v1072_v3 = vsel %vm1020_vm2, %v1066_v59, %v1067_v8 }
 0x14a   : > { %v1073_v55 = vsel %vm1022_vm4, %v1071_v45, %v1072_v3  ;;  %1081 = sbr.rel (%p1353_p12) target bundleno = 543 (0x21f), region = 60 }
 0x14b   : > { %v1074_v5 = vsel %vm1024_vm12, %v1070_v60, %v1073_v55 }
 0x14c   : > { %v1076_v40 = vadd.f32 %v1074_v5, %v996_v46 }
 0x14e   : > { %1077 = vst [vmem:[#allocation2] sm:$0xff] %v1076_v40 }
 0x14f   : > { %v1082_v22 = vld [vmem:[#allocation3] sm:$0xff]  ;;  %v1134_v63 = vld [vmem:[#allocation4] sm:$0xff] }
 0x150   : > { %1083 = vadd.xlane.f32.xlu0 %v1082_v22  ;;  %1135 = vadd.xlane.f32.xlu1 %v1134_v63  ;;  %v2934_v48 = vld [vmem:[#allocation35_spill] sm:$0xff] }
 0x151   : > { %vm1146_vm15 = vcmp.eq.s32.totalorder %v2934_v48, 2  ;;  %vm1144_vm3 = vcmp.eq.s32.totalorder %v2934_v48, 0 }
 0x155   : > { %v1092_v57 = vld [vmem:[#allocation2] sm:$0xff] }
 0x156   : > { %v1094_v31 = vperm.slane %v1092_v57, 0  ;;  %v1095_v43 = vperm.slane %v1092_v57, 1  ;;  %v1096_v0 = vperm.slane %v1092_v57, 2  ;;  %v1097_v37 = vperm.slane %v1092_v57, 3 }
 0x157   : > { %v1098_v12 = vperm.slane %v1092_v57, 4  ;;  %v1099_v39 = vperm.slane %v1092_v57, 5  ;;  %v1100_v41 = vperm.slane %v1092_v57, 6  ;;  %v1101_v52 = vperm.slane %v1092_v57, 7 }
 0x158   : > { %v1110_v9 = vsel %vm1012_vm0, %v1094_v31, 0.0  ;;  %v1111_v17 = vsel %vm1012_vm0, %v1095_v43, 0.0  ;;  %v1113_v23 = vsel %vm1012_vm0, %v1096_v0, 0.0  ;;  %v1115_v58 = vsel %vm1012_vm0, %v1097_v37, 0.0 }
 0x159   : > { %v1112_v29 = vadd.f32 %v1111_v17, %v1110_v9  ;;  %v1117_v53 = vsel %vm1012_vm0, %v1098_v12, 0.0  ;;  %v1119_v35 = vsel %vm1012_vm0, %v1099_v39, 0.0  ;;  %v1121_v19 = vsel %vm1012_vm0, %v1100_v41, 0.0 }
 0x15a   : > { %v1123_v42 = vsel %vm1012_vm0, %v1101_v52, 0.0  ;;  %vm1145_vm0 = vcmp.eq.s32.totalorder %v2934_v48, 1 }
 0x15b   : > { %v1114_v10 = vadd.f32 %v1113_v23, %v1112_v29 }
 0x15d   : > { %v1116_v14 = vadd.f32 %v1115_v58, %v1114_v10 }
 0x15f   : > { %v1118_v27 = vadd.f32 %v1117_v53, %v1116_v14 }
 0x161   : > { %v1120_v56 = vadd.f32 %v1119_v35, %v1118_v27 }
 0x163   : > { %v1122_v47 = vadd.f32 %v1121_v19, %v1120_v56 }
 0x165   : > { %v1124_v38 = vadd.f32 %v1123_v42, %v1122_v47 }
 0x167   : > { %1125 = vadd.xlane.f32.xlu0 %v1124_v38 }
 0x1c3   : > { %v1084_v26 = vpop.xlane.xlu0 %1083  ;;  %v1136_v49 = vpop.xlane.xlu1 %1135 }
 0x1c4   : > { %v1085_v30 = vrot.slane %v1084_v26, 4  ;;  %v1137_v15 = vrot.slane %v1136_v49, 4 }
 0x1c6   : > { %v1086_v50 = vadd.f32 %v1085_v30, %v1084_v26  ;;  %v1138_v62 = vadd.f32 %v1137_v15, %v1136_v49 }
 0x1c8   : > { %v1087_v32 = vrot.slane %v1086_v50, 2  ;;  %v1139_v11 = vrot.slane %v1138_v62, 2 }
 0x1ca   : > { %v1088_v44 = vadd.f32 %v1087_v32, %v1086_v50  ;;  %v1140_v36 = vadd.f32 %v1139_v11, %v1138_v62 }
 0x1cc   : > { %v1089_v2 = vrot.slane %v1088_v44, 1  ;;  %v1141_v24 = vrot.slane %v1140_v36, 1 }
 0x1ce   : > { %v1090_v1 = vadd.f32 %v1089_v2, %v1088_v44  ;;  %v1142_v54 = vadd.f32 %v1141_v24, %v1140_v36 }
 0x1d0   : > { %1359 = vpush %v1090_v1 }
 0x1da   : > { %v1126_v20 = vpop.xlane.xlu0 %1125 }
 0x1db   : > { %v1127_v28 = vrot.slane %v1126_v20, 4 }
 0x1dd   : > { %v1128_v34 = vadd.f32 %v1127_v28, %v1126_v20 }
 0x1df   : > { %v1129_v4 = vrot.slane %v1128_v34, 2 }
 0x1e1   : > { %v1130_v21 = vadd.f32 %v1129_v4, %v1128_v34 }
 0x1e3   : > { %v1131_v61 = vrot.slane %v1130_v21, 1 }
 0x1e5   : > { %v1132_v16 = vadd.f32 %v1131_v61, %v1130_v21 }
 0x1e7   : > { %1361 = vpush %v1132_v16 }
 0x1e8   : > { %1363 = vpush %v1142_v54 }
 0x201   : > { %s1360_s14 = spop %1359 }
 0x202   : > { %v1151_v6 = vstv %s1360_s14 }
 0x218   : > { %s1362_s4 = spop %1361 }
 0x219   : > { %v1149_v13 = vstv %s1362_s4  ;;  %s1364_s10 = spop %1363 }
 0x21a   : > { %v1147_v33 = vstv %s1364_s10 }
 0x21b   : > { %v1148_v7 = vsel %vm1146_vm15, %v1147_v33, 0.0 }
 0x21c   : > { %v1150_v18 = vsel %vm1145_vm0, %v1149_v13, %v1148_v7 }
 0x21d   : > { %v1152_v59 = vsel %vm1144_vm3, %v1151_v6, %v1150_v18 }
 0x21e   : > { %1153 = vst [vmem:[%s2186_s6] sm:$0x1] %v1152_v59 }
 0x21f PF: > { %s2935_s21 = sld [smem:[#allocation24_spill]]  ;;  %s1165_s26 = sshll.u32 %s2186_s6, 4  ;;  %s1166_s26 = int_to_ptr.vmem [resolvable:$true] %s1165_s26 }
 0x220   : > { %s2936_s27 = sld [smem:[#allocation38_spill]]  ;;  %s1155_s19 = scalar_lea.sflag [#allocation7], %s390_s24 }
 0x226   : > { %s2937_s13 = smov %s2936_s27  ;;  %s1163_s16 = scalar_lea.hbm %s2936_s27, %s2935_s21 }
 0x227   : > { %s1167_s29 = sshll.u32 %s1163_s16, 4  ;;  %s1763_s8 = scalar_lea.hbm %s2937_s13, 2  ;;  %s1168_s29 = int_to_ptr.hbm [resolvable:$true] %s1167_s29 }
 0x228   : > { %s1757_s7 = sshra.s32 %s1168_s29, 4  ;;  %s1758_s7 = int_to_ptr.hbm [resolvable:$true] %s1757_s7 }
 0x229   : > { %s1759_s5 = scalar_lea.hbm %s1758_s7, 1  ;;  %p1764_p4 = scmp.lt.s32.totalorder %s1758_s7, %s2937_s13 }
 0x22a   : > { %p1760_p1 = scmp.ne.s32.totalorder %s1758_s7, %s1759_s5  ;;  %p1765_p6 = scmp.lt.s32.totalorder %s1763_s8, %s1759_s5 }
 0x22c   : > { %p1761_p2 = pnand %p1760_p1, %p2081_p10  ;;  %p1766_p8 = por %p1765_p6, %p1764_p4 }
 0x22e   : > { %p1762_p3 = pneg %p1761_p2 }
 0x230   : > { %p1767_p7 = pnand %p1766_p8, %p1762_p3 }
 0x232   : > { %1770 = shalt.err (!%p1767_p7)
}
 0x233   : > { %1371 = dma.vmem_to_hbm [thread:$0]  (%p2081_p10), %s1166_s26, 16, %s1168_s29, %s1155_s19  }
 0x234 PF: > { %s2940_s24 = sld [smem:[#allocation19_spill]]  ;;  %p1377_p13 = scmp.ge.s32.totalorder %s1901_s28, 2 }
 0x235   : > { %s2941_s6 = sld [smem:[#allocation34_spill]] }
 0x23a   : > { %s1179_s14 = sand.u32 1, %s2940_s24  }
 0x23b   : > { %p2942_p11 = scmp.ne.s32.totalorder %s2941_s6, 0  ;;  %s1180_s4 = scalar_lea.sflag [#allocation7], %s1179_s14 }
 0x23d   : > { %p1374_p5 = pnand %p1377_p13, %p2942_p11 }
 0x23f   : > { %p1375_p0 = pneg %p1374_p5 }
 0x241   : > { %1844 = dma.done.wait (%p1375_p0), %s1180_s4, 16  }
 0x242   : > { %1846 = vsyncadd (%p1375_p0), %s1180_s4, 4294967280  ;;  %s26_s28 = sadd.s32 1, %s1901_s28   ;;  %s2944_s15 = sld [smem:[#allocation20_spill]] }
 0x243   : > { %p2772_p9 = scmp.ge.s32.totalorder %s26_s28, 6   ;;  %s2945_s16 = sld [smem:[#allocation21_spill]] }
 0x244   : > { %s2946_s17 = sld [smem:[#allocation32_spill]]  ;;  %s2954_s19 = smov %s1869_s20 }
 0x245   : > { %s2947_s18 = sld [smem:[#allocation22_spill]] }
 0x246   : > { %s2948_s21 = sld [smem:[#allocation29_spill]] }
 0x247   : > { %s2949_s11 = sld [smem:[#allocation30_spill]] }
 0x248   : > { %s2950_s24 = sld [smem:[#allocation25_spill]] }
 0x249   : > { %s2951_s25 = sld [smem:[#allocation26_spill]]  ;;  %25 = sbr.rel (!%p2772_p9) target bundleno = 16 (0x10), region = 126 }
 0x24a   : > { %s2952_s26 = sld [smem:[#allocation27_spill]] }
 0x24b   : > { %s2953_s27 = sld [smem:[#allocation28_spill]] }
 0x24c   : > { %s2955_s20 = smov %s2948_s21  ;;  %s2956_s21 = smov %s1877_s22 }
 0x24d   : > { %s2957_s22 = smov %s1881_s23  ;;  %s2958_s23 = smov %s2949_s11 }
 0x24e   :  { %1185 = vsyncpa [#allocation6], 1 }
 0x24f   :  { %1187 = vsyncpa [#allocation6 + $0x1], 1 }
 0x250   :  { %1188 = vsyncpa [#allocation9], 1 }
 0x251   :  { %1190 = vsyncpa [#allocation9 + $0x1], 1 }
 0x252   :  { %1191 = vsyncpa [#allocation12], 1 }
 0x253   :  { %1193 = vsyncpa [#allocation12 + $0x1], 1 }
 0x254   :  { %1194 = vsyncpa [#allocation7], 1 }
 0x255   :  { %1196 = vsyncpa [#allocation7 + $0x1], 1 }

</bundles_post_ra>
